<compile_context>
chip_gen: v6e
topology: v6e:2x2x1
jax: 0.10.0
libtpu: 0.0.40
codegen_flags: <defaults>
</compile_context>

<pallas_src>
import jax
import jax.numpy as jnp
import numpy as np
from jax import lax
from jax.experimental import pallas as pl
from jax.experimental.pallas import tpu as pltpu

# ----- config (small shapes consistent with the module) -----
VOCAB = 50        # embedding vocab ('ALL' embedding layer)
VOCAB_PAD = 128   # padded to a full lane width for the one-hot matmul
EMB = 32          # embedding_dim
HID = 32          # rnn_hidden_size
LAT = 16          # latent_dim
T = 16            # max_program_size
B = 8             # batch


def encoder_kernel(tok_ref, len_ref, embproj_ref, whh_ref, bg_ref,
                   whead_ref, bhead_ref, z_ref, kl_ref):
    """Full encoder hot path.

    tok_ref     : (T*B, 1)        i32, time-major flattened sorted token ids
    len_ref     : (B, 1)          i32, sorted lengths
    embproj_ref : (VOCAB_PAD, 4H) bf16, (embedding @ W_ih^T), zero-padded rows
    whh_ref     : (H, 4H)         bf16
    bg_ref      : (1, 4H)         f32  (b_ih + b_hh)
    whead_ref   : (H, 2*LAT)      bf16 ([W_mean^T | W_logvar^T])
    bhead_ref   : (1, 2*LAT)      f32
    z_ref       : (B, LAT)        f32
    kl_ref      : (1, 1)          f32
    """
    B_ = len_ref.shape[0]
    H_ = whh_ref.shape[0]
    TB = tok_ref.shape[0]
    T_ = TB // B_
    VPAD = embproj_ref.shape[0]
    LAT_ = whead_ref.shape[1] // 2

    lengths = len_ref[...]                                        # (B, 1) i32

    # ---- fused embedding lookup + input projection (one MXU pass) ----------
    tok = tok_ref[...]                                            # (TB, 1) i32
    col = lax.broadcasted_iota(jnp.int32, (TB, VPAD), 1)
    onehot = jnp.where(tok == col, 1.0, 0.0).astype(jnp.bfloat16)  # (TB, VPAD)
    xproj = (jnp.dot(onehot, embproj_ref[...],
                     preferred_element_type=jnp.float32)
             + bg_ref[...])                                       # (TB, 4H) f32

    # ---- loop-invariant weights resident in vregs ---------------------------
    whh = whh_ref[...]                                            # (H, 4H) bf16

    h = jnp.zeros((B_, H_), jnp.float32)
    c = jnp.zeros((B_, H_), jnp.float32)

    # T_ is static and tiny -> fully unrolled; xproj[t*B:(t+1)*B, :] is a
    # static single-vreg selection (B_=8 rows == one sublane group).
    for t in range(T_):
        g_lin = (jnp.dot(h.astype(jnp.bfloat16), whh,
                         preferred_element_type=jnp.float32)
                 + xproj[t * B_:(t + 1) * B_, :])                 # (B, 4H) f32
        sig = jax.nn.sigmoid(g_lin)                               # one full-vreg EUP op
        i_g = sig[:, 0:H_]
        f_g = sig[:, H_:2 * H_]
        o_g = sig[:, 3 * H_:4 * H_]
        g_g = jnp.tanh(g_lin[:, 2 * H_:3 * H_])
        c_new = f_g * c + i_g * g_g
        h_new = o_g * jnp.tanh(c_new)
        valid = t < lengths                                       # (B, 1) -> bcast
        h = jnp.where(valid, h_new, h)
        c = jnp.where(valid, c_new, c)

    # ---- fused latent heads: one (B,H)x(H,2*LAT) matmul ---------------------
    heads = (jnp.dot(h.astype(jnp.bfloat16), whead_ref[...],
                     preferred_element_type=jnp.float32)
             + bhead_ref[...])                                    # (B, 2*LAT) f32
    z_mean = heads[:, :LAT_]
    z_log_var = heads[:, LAT_:]

    # eval mode: reparameterize(mu, log_var) == mu
    z_ref[...] = z_mean
    # kl_loss = 0.5 * sum(exp(lv) - lv - 1 + mu^2)
    kl_terms = jnp.exp(z_log_var) - z_log_var - 1.0 + z_mean * z_mean
    kl_ref[...] = 0.5 * jnp.sum(kl_terms, keepdims=True)


def init_params(key):
    """Deterministic synthetic parameters with the same shapes as the nn.Module,
    plus the pre-fused / pre-transposed kernel forms."""
    ks = jax.random.split(key, 9)
    s = 0.1
    emb = jax.random.normal(ks[0], (VOCAB, EMB), jnp.float32) * s        # embedding 'ALL'
    w_ih = jax.random.normal(ks[1], (4 * HID, EMB), jnp.float32) * s      # LSTM weight_ih_l0
    w_hh = jax.random.normal(ks[2], (4 * HID, HID), jnp.float32) * s      # LSTM weight_hh_l0
    b_ih = jax.random.normal(ks[3], (4 * HID,), jnp.float32) * s
    b_hh = jax.random.normal(ks[4], (4 * HID,), jnp.float32) * s
    w_mean = jax.random.normal(ks[5], (LAT, HID), jnp.float32) * s        # z_mean.weight
    b_mean = jax.random.normal(ks[6], (LAT,), jnp.float32) * s
    w_lv = jax.random.normal(ks[7], (LAT, HID), jnp.float32) * s          # z_log_var.weight
    b_lv = jax.random.normal(ks[8], (LAT,), jnp.float32) * s

    p = dict(
        # f32 reference-form parameters
        emb=emb,
        w_ih_t=jnp.transpose(w_ih),               # (E, 4H)
        w_hh_t=jnp.transpose(w_hh),               # (H, 4H)
        b_gates=(b_ih + b_hh)[None, :],           # (1, 4H)
        w_mean_t=jnp.transpose(w_mean),           # (H, LAT)
        b_mean=b_mean[None, :],                   # (1, LAT)
        w_lv_t=jnp.transpose(w_lv),               # (H, LAT)
        b_lv=b_lv[None, :],                       # (1, LAT)
    )

    # kernel-form parameters (fused + bf16 MXU operands)
    emb_proj = emb @ p['w_ih_t']                                   # (VOCAB, 4H) f32
    emb_proj_pad = jnp.zeros((VOCAB_PAD, 4 * HID), jnp.float32).at[:VOCAB].set(emb_proj)
    p['k_embproj'] = emb_proj_pad.astype(jnp.bfloat16)             # (VOCAB_PAD, 4H)
    p['k_whh'] = p['w_hh_t'].astype(jnp.bfloat16)                  # (H, 4H)
    p['k_bg'] = p['b_gates']                                       # (1, 4H) f32
    p['k_wheads'] = jnp.concatenate([p['w_mean_t'], p['w_lv_t']],
                                    axis=1).astype(jnp.bfloat16)   # (H, 2*LAT)
    p['k_bheads'] = jnp.concatenate([p['b_mean'], p['b_lv']], axis=1)  # (1, 2*LAT) f32
    return p


def seq_rnn_encoder(inp_seq, length, params):
    """Forward pass. inp_seq: (B, T) int tokens, length: (B,) int lengths."""
    # glue kept outside the kernel: length sort (torch.sort(length, descending=True))
    # and the tiny int token reorder/transpose (512 B).
    sorted_idx = jnp.argsort(-length)
    sorted_len = length[sorted_idx].astype(jnp.int32)[:, None]            # (B, 1)
    tok_sorted = inp_seq[sorted_idx]                                      # (B, T)
    tok_tb = jnp.transpose(tok_sorted).reshape(T * B, 1).astype(jnp.int32)  # time-major

    vmem = pl.BlockSpec(memory_space=pltpu.MemorySpace.VMEM)
    z, kl = pl.pallas_call(
        encoder_kernel,
        out_shape=(jax.ShapeDtypeStruct((B, LAT), jnp.float32),
                   jax.ShapeDtypeStruct((1, 1), jnp.float32)),
        in_specs=[vmem] * 7,
        out_specs=(vmem, vmem),
    )(tok_tb, sorted_len,
      params['k_embproj'], params['k_whh'], params['k_bg'],
      params['k_wheads'], params['k_bheads'])
    # NOTE: like the PyTorch module, outputs stay in length-sorted order.
    return z, kl[0, 0]


def reference(inp_seq, length, params):
    """Pure-JAX f32 reference of the same forward pass (for correctness check)."""
    sorted_idx = jnp.argsort(-length)
    sorted_len = length[sorted_idx]
    emb = jnp.take(params['emb'], inp_seq[sorted_idx], axis=0)            # (B, T, E)
    x_tbe = jnp.transpose(emb, (1, 0, 2))

    def step(carry, xs):
        h, c = carry
        x_t, t = xs
        gates = x_t @ params['w_ih_t'] + h @ params['w_hh_t'] + params['b_gates']
        i = jax.nn.sigmoid(gates[:, :HID])
        f = jax.nn.sigmoid(gates[:, HID:2 * HID])
        g = jnp.tanh(gates[:, 2 * HID:3 * HID])
        o = jax.nn.sigmoid(gates[:, 3 * HID:])
        c_new = f * c + i * g
        h_new = o * jnp.tanh(c_new)
        valid = (t < sorted_len)[:, None]
        return (jnp.where(valid, h_new, h), jnp.where(valid, c_new, c)), None

    (h, _), _ = lax.scan(step,
                         (jnp.zeros((B, HID), jnp.float32),
                          jnp.zeros((B, HID), jnp.float32)),
                         (x_tbe, jnp.arange(T)))
    z_mean = h @ params['w_mean_t'] + params['b_mean']
    z_lv = h @ params['w_lv_t'] + params['b_lv']
    kl = 0.5 * jnp.sum(jnp.exp(z_lv) - z_lv - 1.0 + z_mean ** 2)
    return z_mean, kl


if __name__ == "__main__":
    key = jax.random.PRNGKey(0)
    kp, ki = jax.random.split(key, 2)
    params = init_params(kp)

    inp_seq = jax.random.randint(ki, (B, T), 0, VOCAB, dtype=jnp.int32)
    length = jnp.array([16, 5, 9, 3, 12, 16, 1, 7], dtype=jnp.int32)

    # TODO(synk): training-mode VAE reparameterization noise (std.data.new(...).normal_())
    # is not implemented; eval path (z = mu) is reproduced exactly.
    z, kl = seq_rnn_encoder(inp_seq, length, params)
    jax.block_until_ready((z, kl))

    z_ref, kl_ref = reference(inp_seq, length, params)
    np.testing.assert_allclose(np.asarray(z), np.asarray(z_ref), rtol=5e-2, atol=5e-2)
    np.testing.assert_allclose(float(kl), float(kl_ref), rtol=5e-2, atol=5e-2)

    print("KERNEL_OK")
</pallas_src>

<mosaic_0001>
module attributes {stable_mosaic.version = 11 : i64} {
  func.func @encoder_kernel(%arg0: memref<128x1xi32, #tpu.memory_space<vmem>>, %arg1: memref<8x1xi32, #tpu.memory_space<vmem>>, %arg2: memref<128x128xbf16, #tpu.memory_space<vmem>>, %arg3: memref<32x128xbf16, #tpu.memory_space<vmem>>, %arg4: memref<1x128xf32, #tpu.memory_space<vmem>>, %arg5: memref<32x32xbf16, #tpu.memory_space<vmem>>, %arg6: memref<1x32xf32, #tpu.memory_space<vmem>>, %arg7: memref<8x16xf32, #tpu.memory_space<vmem>>, %arg8: memref<1x1xf32, #tpu.memory_space<vmem>>) attributes {dimension_semantics = [], scalar_prefetch = 0 : i64, scratch_operands = 0 : i64, tpu.core_type = #tpu.core_type<tc>} {
    %c0 = arith.constant 0 : index
    %c0_0 = arith.constant 0 : index
    %0 = vector.load %arg1[%c0, %c0_0] : memref<8x1xi32, #tpu.memory_space<vmem>>, vector<8x1xi32>
    %c0_1 = arith.constant 0 : index
    %c0_2 = arith.constant 0 : index
    %1 = vector.load %arg0[%c0_1, %c0_2] : memref<128x1xi32, #tpu.memory_space<vmem>>, vector<128x1xi32>
    %2 = tpu.iota {dimensions = array<i32: 1>} : vector<128x128xi32>
    %3 = vector.broadcast %1 : vector<128x1xi32> to vector<128x128xi32>
    %4 = arith.cmpi eq, %3, %2 : vector<128x128xi32>
    %cst = arith.constant 1.000000e+00 : f32
    %cst_3 = arith.constant 0.000000e+00 : f32
    %5 = vector.broadcast %cst : f32 to vector<128x128xf32>
    %6 = vector.broadcast %cst_3 : f32 to vector<128x128xf32>
    %7 = arith.select %4, %5, %6 : vector<128x128xi1>, vector<128x128xf32>
    %8 = arith.truncf %7 : vector<128x128xf32> to vector<128x128xbf16>
    %c0_4 = arith.constant 0 : index
    %c0_5 = arith.constant 0 : index
    %9 = vector.load %arg2[%c0_4, %c0_5] : memref<128x128xbf16, #tpu.memory_space<vmem>>, vector<128x128xbf16>
    %cst_6 = arith.constant dense<0.000000e+00> : vector<128x128xf32>
    %10 = tpu.matmul %8, %9, %cst_6 {dimension_numbers = #tpu.dot_dimension_numbers<[1], [0], [0], [1], [0, 0, 1, 1], [], []>} : vector<128x128xbf16>, vector<128x128xbf16>, vector<128x128xf32> -> vector<128x128xf32>
    %c0_7 = arith.constant 0 : index
    %c0_8 = arith.constant 0 : index
    %11 = vector.load %arg4[%c0_7, %c0_8] : memref<1x128xf32, #tpu.memory_space<vmem>>, vector<1x128xf32>
    %12 = vector.broadcast %11 : vector<1x128xf32> to vector<128x128xf32>
    %13 = arith.addf %10, %12 : vector<128x128xf32>
    %c0_9 = arith.constant 0 : index
    %c0_10 = arith.constant 0 : index
    %14 = vector.load %arg3[%c0_9, %c0_10] : memref<32x128xbf16, #tpu.memory_space<vmem>>, vector<32x128xbf16>
    %cst_11 = arith.constant 0.000000e+00 : f32
    %15 = vector.broadcast %cst_11 : f32 to vector<8x32xf32>
    %cst_12 = arith.constant 0.000000e+00 : f32
    %16 = vector.broadcast %cst_12 : f32 to vector<8x32xf32>
    %17 = arith.truncf %15 : vector<8x32xf32> to vector<8x32xbf16>
    %cst_13 = arith.constant dense<0.000000e+00> : vector<8x128xf32>
    %18 = tpu.matmul %17, %14, %cst_13 {dimension_numbers = #tpu.dot_dimension_numbers<[1], [0], [0], [1], [0, 0, 1, 1], [], []>} : vector<8x32xbf16>, vector<32x128xbf16>, vector<8x128xf32> -> vector<8x128xf32>
    %19 = vector.extract_strided_slice %13 {offsets = [0, 0], sizes = [8, 128], strides = [1, 1]} : vector<128x128xf32> to vector<8x128xf32>
    %20 = arith.addf %18, %19 : vector<8x128xf32>
    %21 = arith.negf %20 : vector<8x128xf32>
    %22 = math.exp %21 : vector<8x128xf32>
    %cst_14 = arith.constant 1.000000e+00 : f32
    %23 = vector.broadcast %cst_14 : f32 to vector<8x128xf32>
    %24 = arith.addf %23, %22 : vector<8x128xf32>
    %25 = arith.divf %23, %24 : vector<8x128xf32>
    %26 = vector.extract_strided_slice %25 {offsets = [0, 0], sizes = [8, 32], strides = [1, 1]} : vector<8x128xf32> to vector<8x32xf32>
    %27 = vector.extract_strided_slice %25 {offsets = [0, 32], sizes = [8, 32], strides = [1, 1]} : vector<8x128xf32> to vector<8x32xf32>
    %28 = vector.extract_strided_slice %25 {offsets = [0, 96], sizes = [8, 32], strides = [1, 1]} : vector<8x128xf32> to vector<8x32xf32>
    %29 = vector.extract_strided_slice %20 {offsets = [0, 64], sizes = [8, 32], strides = [1, 1]} : vector<8x128xf32> to vector<8x32xf32>
    %30 = math.tanh %29 : vector<8x32xf32>
    %31 = arith.mulf %27, %16 : vector<8x32xf32>
    %32 = arith.mulf %26, %30 : vector<8x32xf32>
    %33 = arith.addf %31, %32 : vector<8x32xf32>
    %34 = math.tanh %33 : vector<8x32xf32>
    %35 = arith.mulf %28, %34 : vector<8x32xf32>
    %c0_i32 = arith.constant 0 : i32
    %36 = vector.broadcast %c0_i32 : i32 to vector<8x1xi32>
    %37 = arith.cmpi sgt, %0, %36 : vector<8x1xi32>
    %38 = vector.shape_cast %37 : vector<8x1xi1> to vector<8x1xi1>
    %39 = vector.broadcast %38 : vector<8x1xi1> to vector<8x32xi1>
    %40 = arith.select %39, %35, %15 : vector<8x32xi1>, vector<8x32xf32>
    %41 = vector.shape_cast %37 : vector<8x1xi1> to vector<8x1xi1>
    %42 = vector.broadcast %41 : vector<8x1xi1> to vector<8x32xi1>
    %43 = arith.select %42, %33, %16 : vector<8x32xi1>, vector<8x32xf32>
    %44 = arith.truncf %40 : vector<8x32xf32> to vector<8x32xbf16>
    %cst_15 = arith.constant dense<0.000000e+00> : vector<8x128xf32>
    %45 = tpu.matmul %44, %14, %cst_15 {dimension_numbers = #tpu.dot_dimension_numbers<[1], [0], [0], [1], [0, 0, 1, 1], [], []>} : vector<8x32xbf16>, vector<32x128xbf16>, vector<8x128xf32> -> vector<8x128xf32>
    %46 = vector.extract_strided_slice %13 {offsets = [8, 0], sizes = [8, 128], strides = [1, 1]} : vector<128x128xf32> to vector<8x128xf32>
    %47 = arith.addf %45, %46 : vector<8x128xf32>
    %48 = arith.negf %47 : vector<8x128xf32>
    %49 = math.exp %48 : vector<8x128xf32>
    %cst_16 = arith.constant 1.000000e+00 : f32
    %50 = vector.broadcast %cst_16 : f32 to vector<8x128xf32>
    %51 = arith.addf %50, %49 : vector<8x128xf32>
    %52 = arith.divf %50, %51 : vector<8x128xf32>
    %53 = vector.extract_strided_slice %52 {offsets = [0, 0], sizes = [8, 32], strides = [1, 1]} : vector<8x128xf32> to vector<8x32xf32>
    %54 = vector.extract_strided_slice %52 {offsets = [0, 32], sizes = [8, 32], strides = [1, 1]} : vector<8x128xf32> to vector<8x32xf32>
    %55 = vector.extract_strided_slice %52 {offsets = [0, 96], sizes = [8, 32], strides = [1, 1]} : vector<8x128xf32> to vector<8x32xf32>
    %56 = vector.extract_strided_slice %47 {offsets = [0, 64], sizes = [8, 32], strides = [1, 1]} : vector<8x128xf32> to vector<8x32xf32>
    %57 = math.tanh %56 : vector<8x32xf32>
    %58 = arith.mulf %54, %43 : vector<8x32xf32>
    %59 = arith.mulf %53, %57 : vector<8x32xf32>
    %60 = arith.addf %58, %59 : vector<8x32xf32>
    %61 = math.tanh %60 : vector<8x32xf32>
    %62 = arith.mulf %55, %61 : vector<8x32xf32>
    %c1_i32 = arith.constant 1 : i32
    %63 = vector.broadcast %c1_i32 : i32 to vector<8x1xi32>
    %64 = arith.cmpi sgt, %0, %63 : vector<8x1xi32>
    %65 = vector.shape_cast %64 : vector<8x1xi1> to vector<8x1xi1>
    %66 = vector.broadcast %65 : vector<8x1xi1> to vector<8x32xi1>
    %67 = arith.select %66, %62, %40 : vector<8x32xi1>, vector<8x32xf32>
    %68 = vector.shape_cast %64 : vector<8x1xi1> to vector<8x1xi1>
    %69 = vector.broadcast %68 : vector<8x1xi1> to vector<8x32xi1>
    %70 = arith.select %69, %60, %43 : vector<8x32xi1>, vector<8x32xf32>
    %71 = arith.truncf %67 : vector<8x32xf32> to vector<8x32xbf16>
    %cst_17 = arith.constant dense<0.000000e+00> : vector<8x128xf32>
    %72 = tpu.matmul %71, %14, %cst_17 {dimension_numbers = #tpu.dot_dimension_numbers<[1], [0], [0], [1], [0, 0, 1, 1], [], []>} : vector<8x32xbf16>, vector<32x128xbf16>, vector<8x128xf32> -> vector<8x128xf32>
    %73 = vector.extract_strided_slice %13 {offsets = [16, 0], sizes = [8, 128], strides = [1, 1]} : vector<128x128xf32> to vector<8x128xf32>
    %74 = arith.addf %72, %73 : vector<8x128xf32>
    %75 = arith.negf %74 : vector<8x128xf32>
    %76 = math.exp %75 : vector<8x128xf32>
    %cst_18 = arith.constant 1.000000e+00 : f32
    %77 = vector.broadcast %cst_18 : f32 to vector<8x128xf32>
    %78 = arith.addf %77, %76 : vector<8x128xf32>
    %79 = arith.divf %77, %78 : vector<8x128xf32>
    %80 = vector.extract_strided_slice %79 {offsets = [0, 0], sizes = [8, 32], strides = [1, 1]} : vector<8x128xf32> to vector<8x32xf32>
    %81 = vector.extract_strided_slice %79 {offsets = [0, 32], sizes = [8, 32], strides = [1, 1]} : vector<8x128xf32> to vector<8x32xf32>
    %82 = vector.extract_strided_slice %79 {offsets = [0, 96], sizes = [8, 32], strides = [1, 1]} : vector<8x128xf32> to vector<8x32xf32>
    %83 = vector.extract_strided_slice %74 {offsets = [0, 64], sizes = [8, 32], strides = [1, 1]} : vector<8x128xf32> to vector<8x32xf32>
    %84 = math.tanh %83 : vector<8x32xf32>
    %85 = arith.mulf %81, %70 : vector<8x32xf32>
    %86 = arith.mulf %80, %84 : vector<8x32xf32>
    %87 = arith.addf %85, %86 : vector<8x32xf32>
    %88 = math.tanh %87 : vector<8x32xf32>
    %89 = arith.mulf %82, %88 : vector<8x32xf32>
    %c2_i32 = arith.constant 2 : i32
    %90 = vector.broadcast %c2_i32 : i32 to vector<8x1xi32>
    %91 = arith.cmpi sgt, %0, %90 : vector<8x1xi32>
    %92 = vector.shape_cast %91 : vector<8x1xi1> to vector<8x1xi1>
    %93 = vector.broadcast %92 : vector<8x1xi1> to vector<8x32xi1>
    %94 = arith.select %93, %89, %67 : vector<8x32xi1>, vector<8x32xf32>
    %95 = vector.shape_cast %91 : vector<8x1xi1> to vector<8x1xi1>
    %96 = vector.broadcast %95 : vector<8x1xi1> to vector<8x32xi1>
    %97 = arith.select %96, %87, %70 : vector<8x32xi1>, vector<8x32xf32>
    %98 = arith.truncf %94 : vector<8x32xf32> to vector<8x32xbf16>
    %cst_19 = arith.constant dense<0.000000e+00> : vector<8x128xf32>
    %99 = tpu.matmul %98, %14, %cst_19 {dimension_numbers = #tpu.dot_dimension_numbers<[1], [0], [0], [1], [0, 0, 1, 1], [], []>} : vector<8x32xbf16>, vector<32x128xbf16>, vector<8x128xf32> -> vector<8x128xf32>
    %100 = vector.extract_strided_slice %13 {offsets = [24, 0], sizes = [8, 128], strides = [1, 1]} : vector<128x128xf32> to vector<8x128xf32>
    %101 = arith.addf %99, %100 : vector<8x128xf32>
    %102 = arith.negf %101 : vector<8x128xf32>
    %103 = math.exp %102 : vector<8x128xf32>
    %cst_20 = arith.constant 1.000000e+00 : f32
    %104 = vector.broadcast %cst_20 : f32 to vector<8x128xf32>
    %105 = arith.addf %104, %103 : vector<8x128xf32>
    %106 = arith.divf %104, %105 : vector<8x128xf32>
    %107 = vector.extract_strided_slice %106 {offsets = [0, 0], sizes = [8, 32], strides = [1, 1]} : vector<8x128xf32> to vector<8x32xf32>
    %108 = vector.extract_strided_slice %106 {offsets = [0, 32], sizes = [8, 32], strides = [1, 1]} : vector<8x128xf32> to vector<8x32xf32>
    %109 = vector.extract_strided_slice %106 {offsets = [0, 96], sizes = [8, 32], strides = [1, 1]} : vector<8x128xf32> to vector<8x32xf32>
    %110 = vector.extract_strided_slice %101 {offsets = [0, 64], sizes = [8, 32], strides = [1, 1]} : vector<8x128xf32> to vector<8x32xf32>
    %111 = math.tanh %110 : vector<8x32xf32>
    %112 = arith.mulf %108, %97 : vector<8x32xf32>
    %113 = arith.mulf %107, %111 : vector<8x32xf32>
    %114 = arith.addf %112, %113 : vector<8x32xf32>
    %115 = math.tanh %114 : vector<8x32xf32>
    %116 = arith.mulf %109, %115 : vector<8x32xf32>
    %c3_i32 = arith.constant 3 : i32
    %117 = vector.broadcast %c3_i32 : i32 to vector<8x1xi32>
    %118 = arith.cmpi sgt, %0, %117 : vector<8x1xi32>
    %119 = vector.shape_cast %118 : vector<8x1xi1> to vector<8x1xi1>
    %120 = vector.broadcast %119 : vector<8x1xi1> to vector<8x32xi1>
    %121 = arith.select %120, %116, %94 : vector<8x32xi1>, vector<8x32xf32>
    %122 = vector.shape_cast %118 : vector<8x1xi1> to vector<8x1xi1>
    %123 = vector.broadcast %122 : vector<8x1xi1> to vector<8x32xi1>
    %124 = arith.select %123, %114, %97 : vector<8x32xi1>, vector<8x32xf32>
    %125 = arith.truncf %121 : vector<8x32xf32> to vector<8x32xbf16>
    %cst_21 = arith.constant dense<0.000000e+00> : vector<8x128xf32>
    %126 = tpu.matmul %125, %14, %cst_21 {dimension_numbers = #tpu.dot_dimension_numbers<[1], [0], [0], [1], [0, 0, 1, 1], [], []>} : vector<8x32xbf16>, vector<32x128xbf16>, vector<8x128xf32> -> vector<8x128xf32>
    %127 = vector.extract_strided_slice %13 {offsets = [32, 0], sizes = [8, 128], strides = [1, 1]} : vector<128x128xf32> to vector<8x128xf32>
    %128 = arith.addf %126, %127 : vector<8x128xf32>
    %129 = arith.negf %128 : vector<8x128xf32>
    %130 = math.exp %129 : vector<8x128xf32>
    %cst_22 = arith.constant 1.000000e+00 : f32
    %131 = vector.broadcast %cst_22 : f32 to vector<8x128xf32>
    %132 = arith.addf %131, %130 : vector<8x128xf32>
    %133 = arith.divf %131, %132 : vector<8x128xf32>
    %134 = vector.extract_strided_slice %133 {offsets = [0, 0], sizes = [8, 32], strides = [1, 1]} : vector<8x128xf32> to vector<8x32xf32>
    %135 = vector.extract_strided_slice %133 {offsets = [0, 32], sizes = [8, 32], strides = [1, 1]} : vector<8x128xf32> to vector<8x32xf32>
    %136 = vector.extract_strided_slice %133 {offsets = [0, 96], sizes = [8, 32], strides = [1, 1]} : vector<8x128xf32> to vector<8x32xf32>
    %137 = vector.extract_strided_slice %128 {offsets = [0, 64], sizes = [8, 32], strides = [1, 1]} : vector<8x128xf32> to vector<8x32xf32>
    %138 = math.tanh %137 : vector<8x32xf32>
    %139 = arith.mulf %135, %124 : vector<8x32xf32>
    %140 = arith.mulf %134, %138 : vector<8x32xf32>
    %141 = arith.addf %139, %140 : vector<8x32xf32>
    %142 = math.tanh %141 : vector<8x32xf32>
    %143 = arith.mulf %136, %142 : vector<8x32xf32>
    %c4_i32 = arith.constant 4 : i32
    %144 = vector.broadcast %c4_i32 : i32 to vector<8x1xi32>
    %145 = arith.cmpi sgt, %0, %144 : vector<8x1xi32>
    %146 = vector.shape_cast %145 : vector<8x1xi1> to vector<8x1xi1>
    %147 = vector.broadcast %146 : vector<8x1xi1> to vector<8x32xi1>
    %148 = arith.select %147, %143, %121 : vector<8x32xi1>, vector<8x32xf32>
    %149 = vector.shape_cast %145 : vector<8x1xi1> to vector<8x1xi1>
    %150 = vector.broadcast %149 : vector<8x1xi1> to vector<8x32xi1>
    %151 = arith.select %150, %141, %124 : vector<8x32xi1>, vector<8x32xf32>
    %152 = arith.truncf %148 : vector<8x32xf32> to vector<8x32xbf16>
    %cst_23 = arith.constant dense<0.000000e+00> : vector<8x128xf32>
    %153 = tpu.matmul %152, %14, %cst_23 {dimension_numbers = #tpu.dot_dimension_numbers<[1], [0], [0], [1], [0, 0, 1, 1], [], []>} : vector<8x32xbf16>, vector<32x128xbf16>, vector<8x128xf32> -> vector<8x128xf32>
    %154 = vector.extract_strided_slice %13 {offsets = [40, 0], sizes = [8, 128], strides = [1, 1]} : vector<128x128xf32> to vector<8x128xf32>
    %155 = arith.addf %153, %154 : vector<8x128xf32>
    %156 = arith.negf %155 : vector<8x128xf32>
    %157 = math.exp %156 : vector<8x128xf32>
    %cst_24 = arith.constant 1.000000e+00 : f32
    %158 = vector.broadcast %cst_24 : f32 to vector<8x128xf32>
    %159 = arith.addf %158, %157 : vector<8x128xf32>
    %160 = arith.divf %158, %159 : vector<8x128xf32>
    %161 = vector.extract_strided_slice %160 {offsets = [0, 0], sizes = [8, 32], strides = [1, 1]} : vector<8x128xf32> to vector<8x32xf32>
    %162 = vector.extract_strided_slice %160 {offsets = [0, 32], sizes = [8, 32], strides = [1, 1]} : vector<8x128xf32> to vector<8x32xf32>
    %163 = vector.extract_strided_slice %160 {offsets = [0, 96], sizes = [8, 32], strides = [1, 1]} : vector<8x128xf32> to vector<8x32xf32>
    %164 = vector.extract_strided_slice %155 {offsets = [0, 64], sizes = [8, 32], strides = [1, 1]} : vector<8x128xf32> to vector<8x32xf32>
    %165 = math.tanh %164 : vector<8x32xf32>
    %166 = arith.mulf %162, %151 : vector<8x32xf32>
    %167 = arith.mulf %161, %165 : vector<8x32xf32>
    %168 = arith.addf %166, %167 : vector<8x32xf32>
    %169 = math.tanh %168 : vector<8x32xf32>
    %170 = arith.mulf %163, %169 : vector<8x32xf32>
    %c5_i32 = arith.constant 5 : i32
    %171 = vector.broadcast %c5_i32 : i32 to vector<8x1xi32>
    %172 = arith.cmpi sgt, %0, %171 : vector<8x1xi32>
    %173 = vector.shape_cast %172 : vector<8x1xi1> to vector<8x1xi1>
    %174 = vector.broadcast %173 : vector<8x1xi1> to vector<8x32xi1>
    %175 = arith.select %174, %170, %148 : vector<8x32xi1>, vector<8x32xf32>
    %176 = vector.shape_cast %172 : vector<8x1xi1> to vector<8x1xi1>
    %177 = vector.broadcast %176 : vector<8x1xi1> to vector<8x32xi1>
    %178 = arith.select %177, %168, %151 : vector<8x32xi1>, vector<8x32xf32>
    %179 = arith.truncf %175 : vector<8x32xf32> to vector<8x32xbf16>
    %cst_25 = arith.constant dense<0.000000e+00> : vector<8x128xf32>
    %180 = tpu.matmul %179, %14, %cst_25 {dimension_numbers = #tpu.dot_dimension_numbers<[1], [0], [0], [1], [0, 0, 1, 1], [], []>} : vector<8x32xbf16>, vector<32x128xbf16>, vector<8x128xf32> -> vector<8x128xf32>
    %181 = vector.extract_strided_slice %13 {offsets = [48, 0], sizes = [8, 128], strides = [1, 1]} : vector<128x128xf32> to vector<8x128xf32>
    %182 = arith.addf %180, %181 : vector<8x128xf32>
    %183 = arith.negf %182 : vector<8x128xf32>
    %184 = math.exp %183 : vector<8x128xf32>
    %cst_26 = arith.constant 1.000000e+00 : f32
    %185 = vector.broadcast %cst_26 : f32 to vector<8x128xf32>
    %186 = arith.addf %185, %184 : vector<8x128xf32>
    %187 = arith.divf %185, %186 : vector<8x128xf32>
    %188 = vector.extract_strided_slice %187 {offsets = [0, 0], sizes = [8, 32], strides = [1, 1]} : vector<8x128xf32> to vector<8x32xf32>
    %189 = vector.extract_strided_slice %187 {offsets = [0, 32], sizes = [8, 32], strides = [1, 1]} : vector<8x128xf32> to vector<8x32xf32>
    %190 = vector.extract_strided_slice %187 {offsets = [0, 96], sizes = [8, 32], strides = [1, 1]} : vector<8x128xf32> to vector<8x32xf32>
    %191 = vector.extract_strided_slice %182 {offsets = [0, 64], sizes = [8, 32], strides = [1, 1]} : vector<8x128xf32> to vector<8x32xf32>
    %192 = math.tanh %191 : vector<8x32xf32>
    %193 = arith.mulf %189, %178 : vector<8x32xf32>
    %194 = arith.mulf %188, %192 : vector<8x32xf32>
    %195 = arith.addf %193, %194 : vector<8x32xf32>
    %196 = math.tanh %195 : vector<8x32xf32>
    %197 = arith.mulf %190, %196 : vector<8x32xf32>
    %c6_i32 = arith.constant 6 : i32
    %198 = vector.broadcast %c6_i32 : i32 to vector<8x1xi32>
    %199 = arith.cmpi sgt, %0, %198 : vector<8x1xi32>
    %200 = vector.shape_cast %199 : vector<8x1xi1> to vector<8x1xi1>
    %201 = vector.broadcast %200 : vector<8x1xi1> to vector<8x32xi1>
    %202 = arith.select %201, %197, %175 : vector<8x32xi1>, vector<8x32xf32>
    %203 = vector.shape_cast %199 : vector<8x1xi1> to vector<8x1xi1>
    %204 = vector.broadcast %203 : vector<8x1xi1> to vector<8x32xi1>
    %205 = arith.select %204, %195, %178 : vector<8x32xi1>, vector<8x32xf32>
    %206 = arith.truncf %202 : vector<8x32xf32> to vector<8x32xbf16>
    %cst_27 = arith.constant dense<0.000000e+00> : vector<8x128xf32>
    %207 = tpu.matmul %206, %14, %cst_27 {dimension_numbers = #tpu.dot_dimension_numbers<[1], [0], [0], [1], [0, 0, 1, 1], [], []>} : vector<8x32xbf16>, vector<32x128xbf16>, vector<8x128xf32> -> vector<8x128xf32>
    %208 = vector.extract_strided_slice %13 {offsets = [56, 0], sizes = [8, 128], strides = [1, 1]} : vector<128x128xf32> to vector<8x128xf32>
    %209 = arith.addf %207, %208 : vector<8x128xf32>
    %210 = arith.negf %209 : vector<8x128xf32>
    %211 = math.exp %210 : vector<8x128xf32>
    %cst_28 = arith.constant 1.000000e+00 : f32
    %212 = vector.broadcast %cst_28 : f32 to vector<8x128xf32>
    %213 = arith.addf %212, %211 : vector<8x128xf32>
    %214 = arith.divf %212, %213 : vector<8x128xf32>
    %215 = vector.extract_strided_slice %214 {offsets = [0, 0], sizes = [8, 32], strides = [1, 1]} : vector<8x128xf32> to vector<8x32xf32>
    %216 = vector.extract_strided_slice %214 {offsets = [0, 32], sizes = [8, 32], strides = [1, 1]} : vector<8x128xf32> to vector<8x32xf32>
    %217 = vector.extract_strided_slice %214 {offsets = [0, 96], sizes = [8, 32], strides = [1, 1]} : vector<8x128xf32> to vector<8x32xf32>
    %218 = vector.extract_strided_slice %209 {offsets = [0, 64], sizes = [8, 32], strides = [1, 1]} : vector<8x128xf32> to vector<8x32xf32>
    %219 = math.tanh %218 : vector<8x32xf32>
    %220 = arith.mulf %216, %205 : vector<8x32xf32>
    %221 = arith.mulf %215, %219 : vector<8x32xf32>
    %222 = arith.addf %220, %221 : vector<8x32xf32>
    %223 = math.tanh %222 : vector<8x32xf32>
    %224 = arith.mulf %217, %223 : vector<8x32xf32>
    %c7_i32 = arith.constant 7 : i32
    %225 = vector.broadcast %c7_i32 : i32 to vector<8x1xi32>
    %226 = arith.cmpi sgt, %0, %225 : vector<8x1xi32>
    %227 = vector.shape_cast %226 : vector<8x1xi1> to vector<8x1xi1>
    %228 = vector.broadcast %227 : vector<8x1xi1> to vector<8x32xi1>
    %229 = arith.select %228, %224, %202 : vector<8x32xi1>, vector<8x32xf32>
    %230 = vector.shape_cast %226 : vector<8x1xi1> to vector<8x1xi1>
    %231 = vector.broadcast %230 : vector<8x1xi1> to vector<8x32xi1>
    %232 = arith.select %231, %222, %205 : vector<8x32xi1>, vector<8x32xf32>
    %233 = arith.truncf %229 : vector<8x32xf32> to vector<8x32xbf16>
    %cst_29 = arith.constant dense<0.000000e+00> : vector<8x128xf32>
    %234 = tpu.matmul %233, %14, %cst_29 {dimension_numbers = #tpu.dot_dimension_numbers<[1], [0], [0], [1], [0, 0, 1, 1], [], []>} : vector<8x32xbf16>, vector<32x128xbf16>, vector<8x128xf32> -> vector<8x128xf32>
    %235 = vector.extract_strided_slice %13 {offsets = [64, 0], sizes = [8, 128], strides = [1, 1]} : vector<128x128xf32> to vector<8x128xf32>
    %236 = arith.addf %234, %235 : vector<8x128xf32>
    %237 = arith.negf %236 : vector<8x128xf32>
    %238 = math.exp %237 : vector<8x128xf32>
    %cst_30 = arith.constant 1.000000e+00 : f32
    %239 = vector.broadcast %cst_30 : f32 to vector<8x128xf32>
    %240 = arith.addf %239, %238 : vector<8x128xf32>
    %241 = arith.divf %239, %240 : vector<8x128xf32>
    %242 = vector.extract_strided_slice %241 {offsets = [0, 0], sizes = [8, 32], strides = [1, 1]} : vector<8x128xf32> to vector<8x32xf32>
    %243 = vector.extract_strided_slice %241 {offsets = [0, 32], sizes = [8, 32], strides = [1, 1]} : vector<8x128xf32> to vector<8x32xf32>
    %244 = vector.extract_strided_slice %241 {offsets = [0, 96], sizes = [8, 32], strides = [1, 1]} : vector<8x128xf32> to vector<8x32xf32>
    %245 = vector.extract_strided_slice %236 {offsets = [0, 64], sizes = [8, 32], strides = [1, 1]} : vector<8x128xf32> to vector<8x32xf32>
    %246 = math.tanh %245 : vector<8x32xf32>
    %247 = arith.mulf %243, %232 : vector<8x32xf32>
    %248 = arith.mulf %242, %246 : vector<8x32xf32>
    %249 = arith.addf %247, %248 : vector<8x32xf32>
    %250 = math.tanh %249 : vector<8x32xf32>
    %251 = arith.mulf %244, %250 : vector<8x32xf32>
    %c8_i32 = arith.constant 8 : i32
    %252 = vector.broadcast %c8_i32 : i32 to vector<8x1xi32>
    %253 = arith.cmpi sgt, %0, %252 : vector<8x1xi32>
    %254 = vector.shape_cast %253 : vector<8x1xi1> to vector<8x1xi1>
    %255 = vector.broadcast %254 : vector<8x1xi1> to vector<8x32xi1>
    %256 = arith.select %255, %251, %229 : vector<8x32xi1>, vector<8x32xf32>
    %257 = vector.shape_cast %253 : vector<8x1xi1> to vector<8x1xi1>
    %258 = vector.broadcast %257 : vector<8x1xi1> to vector<8x32xi1>
    %259 = arith.select %258, %249, %232 : vector<8x32xi1>, vector<8x32xf32>
    %260 = arith.truncf %256 : vector<8x32xf32> to vector<8x32xbf16>
    %cst_31 = arith.constant dense<0.000000e+00> : vector<8x128xf32>
    %261 = tpu.matmul %260, %14, %cst_31 {dimension_numbers = #tpu.dot_dimension_numbers<[1], [0], [0], [1], [0, 0, 1, 1], [], []>} : vector<8x32xbf16>, vector<32x128xbf16>, vector<8x128xf32> -> vector<8x128xf32>
    %262 = vector.extract_strided_slice %13 {offsets = [72, 0], sizes = [8, 128], strides = [1, 1]} : vector<128x128xf32> to vector<8x128xf32>
    %263 = arith.addf %261, %262 : vector<8x128xf32>
    %264 = arith.negf %263 : vector<8x128xf32>
    %265 = math.exp %264 : vector<8x128xf32>
    %cst_32 = arith.constant 1.000000e+00 : f32
    %266 = vector.broadcast %cst_32 : f32 to vector<8x128xf32>
    %267 = arith.addf %266, %265 : vector<8x128xf32>
    %268 = arith.divf %266, %267 : vector<8x128xf32>
    %269 = vector.extract_strided_slice %268 {offsets = [0, 0], sizes = [8, 32], strides = [1, 1]} : vector<8x128xf32> to vector<8x32xf32>
    %270 = vector.extract_strided_slice %268 {offsets = [0, 32], sizes = [8, 32], strides = [1, 1]} : vector<8x128xf32> to vector<8x32xf32>
    %271 = vector.extract_strided_slice %268 {offsets = [0, 96], sizes = [8, 32], strides = [1, 1]} : vector<8x128xf32> to vector<8x32xf32>
    %272 = vector.extract_strided_slice %263 {offsets = [0, 64], sizes = [8, 32], strides = [1, 1]} : vector<8x128xf32> to vector<8x32xf32>
    %273 = math.tanh %272 : vector<8x32xf32>
    %274 = arith.mulf %270, %259 : vector<8x32xf32>
    %275 = arith.mulf %269, %273 : vector<8x32xf32>
    %276 = arith.addf %274, %275 : vector<8x32xf32>
    %277 = math.tanh %276 : vector<8x32xf32>
    %278 = arith.mulf %271, %277 : vector<8x32xf32>
    %c9_i32 = arith.constant 9 : i32
    %279 = vector.broadcast %c9_i32 : i32 to vector<8x1xi32>
    %280 = arith.cmpi sgt, %0, %279 : vector<8x1xi32>
    %281 = vector.shape_cast %280 : vector<8x1xi1> to vector<8x1xi1>
    %282 = vector.broadcast %281 : vector<8x1xi1> to vector<8x32xi1>
    %283 = arith.select %282, %278, %256 : vector<8x32xi1>, vector<8x32xf32>
    %284 = vector.shape_cast %280 : vector<8x1xi1> to vector<8x1xi1>
    %285 = vector.broadcast %284 : vector<8x1xi1> to vector<8x32xi1>
    %286 = arith.select %285, %276, %259 : vector<8x32xi1>, vector<8x32xf32>
    %287 = arith.truncf %283 : vector<8x32xf32> to vector<8x32xbf16>
    %cst_33 = arith.constant dense<0.000000e+00> : vector<8x128xf32>
    %288 = tpu.matmul %287, %14, %cst_33 {dimension_numbers = #tpu.dot_dimension_numbers<[1], [0], [0], [1], [0, 0, 1, 1], [], []>} : vector<8x32xbf16>, vector<32x128xbf16>, vector<8x128xf32> -> vector<8x128xf32>
    %289 = vector.extract_strided_slice %13 {offsets = [80, 0], sizes = [8, 128], strides = [1, 1]} : vector<128x128xf32> to vector<8x128xf32>
    %290 = arith.addf %288, %289 : vector<8x128xf32>
    %291 = arith.negf %290 : vector<8x128xf32>
    %292 = math.exp %291 : vector<8x128xf32>
    %cst_34 = arith.constant 1.000000e+00 : f32
    %293 = vector.broadcast %cst_34 : f32 to vector<8x128xf32>
    %294 = arith.addf %293, %292 : vector<8x128xf32>
    %295 = arith.divf %293, %294 : vector<8x128xf32>
    %296 = vector.extract_strided_slice %295 {offsets = [0, 0], sizes = [8, 32], strides = [1, 1]} : vector<8x128xf32> to vector<8x32xf32>
    %297 = vector.extract_strided_slice %295 {offsets = [0, 32], sizes = [8, 32], strides = [1, 1]} : vector<8x128xf32> to vector<8x32xf32>
    %298 = vector.extract_strided_slice %295 {offsets = [0, 96], sizes = [8, 32], strides = [1, 1]} : vector<8x128xf32> to vector<8x32xf32>
    %299 = vector.extract_strided_slice %290 {offsets = [0, 64], sizes = [8, 32], strides = [1, 1]} : vector<8x128xf32> to vector<8x32xf32>
    %300 = math.tanh %299 : vector<8x32xf32>
    %301 = arith.mulf %297, %286 : vector<8x32xf32>
    %302 = arith.mulf %296, %300 : vector<8x32xf32>
    %303 = arith.addf %301, %302 : vector<8x32xf32>
    %304 = math.tanh %303 : vector<8x32xf32>
    %305 = arith.mulf %298, %304 : vector<8x32xf32>
    %c10_i32 = arith.constant 10 : i32
    %306 = vector.broadcast %c10_i32 : i32 to vector<8x1xi32>
    %307 = arith.cmpi sgt, %0, %306 : vector<8x1xi32>
    %308 = vector.shape_cast %307 : vector<8x1xi1> to vector<8x1xi1>
    %309 = vector.broadcast %308 : vector<8x1xi1> to vector<8x32xi1>
    %310 = arith.select %309, %305, %283 : vector<8x32xi1>, vector<8x32xf32>
    %311 = vector.shape_cast %307 : vector<8x1xi1> to vector<8x1xi1>
    %312 = vector.broadcast %311 : vector<8x1xi1> to vector<8x32xi1>
    %313 = arith.select %312, %303, %286 : vector<8x32xi1>, vector<8x32xf32>
    %314 = arith.truncf %310 : vector<8x32xf32> to vector<8x32xbf16>
    %cst_35 = arith.constant dense<0.000000e+00> : vector<8x128xf32>
    %315 = tpu.matmul %314, %14, %cst_35 {dimension_numbers = #tpu.dot_dimension_numbers<[1], [0], [0], [1], [0, 0, 1, 1], [], []>} : vector<8x32xbf16>, vector<32x128xbf16>, vector<8x128xf32> -> vector<8x128xf32>
    %316 = vector.extract_strided_slice %13 {offsets = [88, 0], sizes = [8, 128], strides = [1, 1]} : vector<128x128xf32> to vector<8x128xf32>
    %317 = arith.addf %315, %316 : vector<8x128xf32>
    %318 = arith.negf %317 : vector<8x128xf32>
    %319 = math.exp %318 : vector<8x128xf32>
    %cst_36 = arith.constant 1.000000e+00 : f32
    %320 = vector.broadcast %cst_36 : f32 to vector<8x128xf32>
    %321 = arith.addf %320, %319 : vector<8x128xf32>
    %322 = arith.divf %320, %321 : vector<8x128xf32>
    %323 = vector.extract_strided_slice %322 {offsets = [0, 0], sizes = [8, 32], strides = [1, 1]} : vector<8x128xf32> to vector<8x32xf32>
    %324 = vector.extract_strided_slice %322 {offsets = [0, 32], sizes = [8, 32], strides = [1, 1]} : vector<8x128xf32> to vector<8x32xf32>
    %325 = vector.extract_strided_slice %322 {offsets = [0, 96], sizes = [8, 32], strides = [1, 1]} : vector<8x128xf32> to vector<8x32xf32>
    %326 = vector.extract_strided_slice %317 {offsets = [0, 64], sizes = [8, 32], strides = [1, 1]} : vector<8x128xf32> to vector<8x32xf32>
    %327 = math.tanh %326 : vector<8x32xf32>
    %328 = arith.mulf %324, %313 : vector<8x32xf32>
    %329 = arith.mulf %323, %327 : vector<8x32xf32>
    %330 = arith.addf %328, %329 : vector<8x32xf32>
    %331 = math.tanh %330 : vector<8x32xf32>
    %332 = arith.mulf %325, %331 : vector<8x32xf32>
    %c11_i32 = arith.constant 11 : i32
    %333 = vector.broadcast %c11_i32 : i32 to vector<8x1xi32>
    %334 = arith.cmpi sgt, %0, %333 : vector<8x1xi32>
    %335 = vector.shape_cast %334 : vector<8x1xi1> to vector<8x1xi1>
    %336 = vector.broadcast %335 : vector<8x1xi1> to vector<8x32xi1>
    %337 = arith.select %336, %332, %310 : vector<8x32xi1>, vector<8x32xf32>
    %338 = vector.shape_cast %334 : vector<8x1xi1> to vector<8x1xi1>
    %339 = vector.broadcast %338 : vector<8x1xi1> to vector<8x32xi1>
    %340 = arith.select %339, %330, %313 : vector<8x32xi1>, vector<8x32xf32>
    %341 = arith.truncf %337 : vector<8x32xf32> to vector<8x32xbf16>
    %cst_37 = arith.constant dense<0.000000e+00> : vector<8x128xf32>
    %342 = tpu.matmul %341, %14, %cst_37 {dimension_numbers = #tpu.dot_dimension_numbers<[1], [0], [0], [1], [0, 0, 1, 1], [], []>} : vector<8x32xbf16>, vector<32x128xbf16>, vector<8x128xf32> -> vector<8x128xf32>
    %343 = vector.extract_strided_slice %13 {offsets = [96, 0], sizes = [8, 128], strides = [1, 1]} : vector<128x128xf32> to vector<8x128xf32>
    %344 = arith.addf %342, %343 : vector<8x128xf32>
    %345 = arith.negf %344 : vector<8x128xf32>
    %346 = math.exp %345 : vector<8x128xf32>
    %cst_38 = arith.constant 1.000000e+00 : f32
    %347 = vector.broadcast %cst_38 : f32 to vector<8x128xf32>
    %348 = arith.addf %347, %346 : vector<8x128xf32>
    %349 = arith.divf %347, %348 : vector<8x128xf32>
    %350 = vector.extract_strided_slice %349 {offsets = [0, 0], sizes = [8, 32], strides = [1, 1]} : vector<8x128xf32> to vector<8x32xf32>
    %351 = vector.extract_strided_slice %349 {offsets = [0, 32], sizes = [8, 32], strides = [1, 1]} : vector<8x128xf32> to vector<8x32xf32>
    %352 = vector.extract_strided_slice %349 {offsets = [0, 96], sizes = [8, 32], strides = [1, 1]} : vector<8x128xf32> to vector<8x32xf32>
    %353 = vector.extract_strided_slice %344 {offsets = [0, 64], sizes = [8, 32], strides = [1, 1]} : vector<8x128xf32> to vector<8x32xf32>
    %354 = math.tanh %353 : vector<8x32xf32>
    %355 = arith.mulf %351, %340 : vector<8x32xf32>
    %356 = arith.mulf %350, %354 : vector<8x32xf32>
    %357 = arith.addf %355, %356 : vector<8x32xf32>
    %358 = math.tanh %357 : vector<8x32xf32>
    %359 = arith.mulf %352, %358 : vector<8x32xf32>
    %c12_i32 = arith.constant 12 : i32
    %360 = vector.broadcast %c12_i32 : i32 to vector<8x1xi32>
    %361 = arith.cmpi sgt, %0, %360 : vector<8x1xi32>
    %362 = vector.shape_cast %361 : vector<8x1xi1> to vector<8x1xi1>
    %363 = vector.broadcast %362 : vector<8x1xi1> to vector<8x32xi1>
    %364 = arith.select %363, %359, %337 : vector<8x32xi1>, vector<8x32xf32>
    %365 = vector.shape_cast %361 : vector<8x1xi1> to vector<8x1xi1>
    %366 = vector.broadcast %365 : vector<8x1xi1> to vector<8x32xi1>
    %367 = arith.select %366, %357, %340 : vector<8x32xi1>, vector<8x32xf32>
    %368 = arith.truncf %364 : vector<8x32xf32> to vector<8x32xbf16>
    %cst_39 = arith.constant dense<0.000000e+00> : vector<8x128xf32>
    %369 = tpu.matmul %368, %14, %cst_39 {dimension_numbers = #tpu.dot_dimension_numbers<[1], [0], [0], [1], [0, 0, 1, 1], [], []>} : vector<8x32xbf16>, vector<32x128xbf16>, vector<8x128xf32> -> vector<8x128xf32>
    %370 = vector.extract_strided_slice %13 {offsets = [104, 0], sizes = [8, 128], strides = [1, 1]} : vector<128x128xf32> to vector<8x128xf32>
    %371 = arith.addf %369, %370 : vector<8x128xf32>
    %372 = arith.negf %371 : vector<8x128xf32>
    %373 = math.exp %372 : vector<8x128xf32>
    %cst_40 = arith.constant 1.000000e+00 : f32
    %374 = vector.broadcast %cst_40 : f32 to vector<8x128xf32>
    %375 = arith.addf %374, %373 : vector<8x128xf32>
    %376 = arith.divf %374, %375 : vector<8x128xf32>
    %377 = vector.extract_strided_slice %376 {offsets = [0, 0], sizes = [8, 32], strides = [1, 1]} : vector<8x128xf32> to vector<8x32xf32>
    %378 = vector.extract_strided_slice %376 {offsets = [0, 32], sizes = [8, 32], strides = [1, 1]} : vector<8x128xf32> to vector<8x32xf32>
    %379 = vector.extract_strided_slice %376 {offsets = [0, 96], sizes = [8, 32], strides = [1, 1]} : vector<8x128xf32> to vector<8x32xf32>
    %380 = vector.extract_strided_slice %371 {offsets = [0, 64], sizes = [8, 32], strides = [1, 1]} : vector<8x128xf32> to vector<8x32xf32>
    %381 = math.tanh %380 : vector<8x32xf32>
    %382 = arith.mulf %378, %367 : vector<8x32xf32>
    %383 = arith.mulf %377, %381 : vector<8x32xf32>
    %384 = arith.addf %382, %383 : vector<8x32xf32>
    %385 = math.tanh %384 : vector<8x32xf32>
    %386 = arith.mulf %379, %385 : vector<8x32xf32>
    %c13_i32 = arith.constant 13 : i32
    %387 = vector.broadcast %c13_i32 : i32 to vector<8x1xi32>
    %388 = arith.cmpi sgt, %0, %387 : vector<8x1xi32>
    %389 = vector.shape_cast %388 : vector<8x1xi1> to vector<8x1xi1>
    %390 = vector.broadcast %389 : vector<8x1xi1> to vector<8x32xi1>
    %391 = arith.select %390, %386, %364 : vector<8x32xi1>, vector<8x32xf32>
    %392 = vector.shape_cast %388 : vector<8x1xi1> to vector<8x1xi1>
    %393 = vector.broadcast %392 : vector<8x1xi1> to vector<8x32xi1>
    %394 = arith.select %393, %384, %367 : vector<8x32xi1>, vector<8x32xf32>
    %395 = arith.truncf %391 : vector<8x32xf32> to vector<8x32xbf16>
    %cst_41 = arith.constant dense<0.000000e+00> : vector<8x128xf32>
    %396 = tpu.matmul %395, %14, %cst_41 {dimension_numbers = #tpu.dot_dimension_numbers<[1], [0], [0], [1], [0, 0, 1, 1], [], []>} : vector<8x32xbf16>, vector<32x128xbf16>, vector<8x128xf32> -> vector<8x128xf32>
    %397 = vector.extract_strided_slice %13 {offsets = [112, 0], sizes = [8, 128], strides = [1, 1]} : vector<128x128xf32> to vector<8x128xf32>
    %398 = arith.addf %396, %397 : vector<8x128xf32>
    %399 = arith.negf %398 : vector<8x128xf32>
    %400 = math.exp %399 : vector<8x128xf32>
    %cst_42 = arith.constant 1.000000e+00 : f32
    %401 = vector.broadcast %cst_42 : f32 to vector<8x128xf32>
    %402 = arith.addf %401, %400 : vector<8x128xf32>
    %403 = arith.divf %401, %402 : vector<8x128xf32>
    %404 = vector.extract_strided_slice %403 {offsets = [0, 0], sizes = [8, 32], strides = [1, 1]} : vector<8x128xf32> to vector<8x32xf32>
    %405 = vector.extract_strided_slice %403 {offsets = [0, 32], sizes = [8, 32], strides = [1, 1]} : vector<8x128xf32> to vector<8x32xf32>
    %406 = vector.extract_strided_slice %403 {offsets = [0, 96], sizes = [8, 32], strides = [1, 1]} : vector<8x128xf32> to vector<8x32xf32>
    %407 = vector.extract_strided_slice %398 {offsets = [0, 64], sizes = [8, 32], strides = [1, 1]} : vector<8x128xf32> to vector<8x32xf32>
    %408 = math.tanh %407 : vector<8x32xf32>
    %409 = arith.mulf %405, %394 : vector<8x32xf32>
    %410 = arith.mulf %404, %408 : vector<8x32xf32>
    %411 = arith.addf %409, %410 : vector<8x32xf32>
    %412 = math.tanh %411 : vector<8x32xf32>
    %413 = arith.mulf %406, %412 : vector<8x32xf32>
    %c14_i32 = arith.constant 14 : i32
    %414 = vector.broadcast %c14_i32 : i32 to vector<8x1xi32>
    %415 = arith.cmpi sgt, %0, %414 : vector<8x1xi32>
    %416 = vector.shape_cast %415 : vector<8x1xi1> to vector<8x1xi1>
    %417 = vector.broadcast %416 : vector<8x1xi1> to vector<8x32xi1>
    %418 = arith.select %417, %413, %391 : vector<8x32xi1>, vector<8x32xf32>
    %419 = vector.shape_cast %415 : vector<8x1xi1> to vector<8x1xi1>
    %420 = vector.broadcast %419 : vector<8x1xi1> to vector<8x32xi1>
    %421 = arith.select %420, %411, %394 : vector<8x32xi1>, vector<8x32xf32>
    %422 = arith.truncf %418 : vector<8x32xf32> to vector<8x32xbf16>
    %cst_43 = arith.constant dense<0.000000e+00> : vector<8x128xf32>
    %423 = tpu.matmul %422, %14, %cst_43 {dimension_numbers = #tpu.dot_dimension_numbers<[1], [0], [0], [1], [0, 0, 1, 1], [], []>} : vector<8x32xbf16>, vector<32x128xbf16>, vector<8x128xf32> -> vector<8x128xf32>
    %424 = vector.extract_strided_slice %13 {offsets = [120, 0], sizes = [8, 128], strides = [1, 1]} : vector<128x128xf32> to vector<8x128xf32>
    %425 = arith.addf %423, %424 : vector<8x128xf32>
    %426 = arith.negf %425 : vector<8x128xf32>
    %427 = math.exp %426 : vector<8x128xf32>
    %cst_44 = arith.constant 1.000000e+00 : f32
    %428 = vector.broadcast %cst_44 : f32 to vector<8x128xf32>
    %429 = arith.addf %428, %427 : vector<8x128xf32>
    %430 = arith.divf %428, %429 : vector<8x128xf32>
    %431 = vector.extract_strided_slice %430 {offsets = [0, 0], sizes = [8, 32], strides = [1, 1]} : vector<8x128xf32> to vector<8x32xf32>
    %432 = vector.extract_strided_slice %430 {offsets = [0, 32], sizes = [8, 32], strides = [1, 1]} : vector<8x128xf32> to vector<8x32xf32>
    %433 = vector.extract_strided_slice %430 {offsets = [0, 96], sizes = [8, 32], strides = [1, 1]} : vector<8x128xf32> to vector<8x32xf32>
    %434 = vector.extract_strided_slice %425 {offsets = [0, 64], sizes = [8, 32], strides = [1, 1]} : vector<8x128xf32> to vector<8x32xf32>
    %435 = math.tanh %434 : vector<8x32xf32>
    %436 = arith.mulf %432, %421 : vector<8x32xf32>
    %437 = arith.mulf %431, %435 : vector<8x32xf32>
    %438 = arith.addf %436, %437 : vector<8x32xf32>
    %439 = math.tanh %438 : vector<8x32xf32>
    %440 = arith.mulf %433, %439 : vector<8x32xf32>
    %c15_i32 = arith.constant 15 : i32
    %441 = vector.broadcast %c15_i32 : i32 to vector<8x1xi32>
    %442 = arith.cmpi sgt, %0, %441 : vector<8x1xi32>
    %443 = vector.shape_cast %442 : vector<8x1xi1> to vector<8x1xi1>
    %444 = vector.broadcast %443 : vector<8x1xi1> to vector<8x32xi1>
    %445 = arith.select %444, %440, %418 : vector<8x32xi1>, vector<8x32xf32>
    %446 = arith.truncf %445 : vector<8x32xf32> to vector<8x32xbf16>
    %c0_45 = arith.constant 0 : index
    %c0_46 = arith.constant 0 : index
    %447 = vector.load %arg5[%c0_45, %c0_46] : memref<32x32xbf16, #tpu.memory_space<vmem>>, vector<32x32xbf16>
    %cst_47 = arith.constant dense<0.000000e+00> : vector<8x32xf32>
    %448 = tpu.matmul %446, %447, %cst_47 {dimension_numbers = #tpu.dot_dimension_numbers<[1], [0], [0], [1], [0, 0, 1, 1], [], []>} : vector<8x32xbf16>, vector<32x32xbf16>, vector<8x32xf32> -> vector<8x32xf32>
    %c0_48 = arith.constant 0 : index
    %c0_49 = arith.constant 0 : index
    %449 = vector.load %arg6[%c0_48, %c0_49] : memref<1x32xf32, #tpu.memory_space<vmem>>, vector<1x32xf32>
    %450 = vector.broadcast %449 : vector<1x32xf32> to vector<8x32xf32>
    %451 = arith.addf %448, %450 : vector<8x32xf32>
    %452 = vector.extract_strided_slice %451 {offsets = [0, 0], sizes = [8, 16], strides = [1, 1]} : vector<8x32xf32> to vector<8x16xf32>
    %453 = vector.extract_strided_slice %451 {offsets = [0, 16], sizes = [8, 16], strides = [1, 1]} : vector<8x32xf32> to vector<8x16xf32>
    %c0_50 = arith.constant 0 : index
    %c0_51 = arith.constant 0 : index
    %454 = vector.load %arg7[%c0_50, %c0_51] : memref<8x16xf32, #tpu.memory_space<vmem>>, vector<8x16xf32>
    tpu.vector_store %arg7[%c0_50, %c0_51], %452 {strides = array<i32>} : memref<8x16xf32, #tpu.memory_space<vmem>>, vector<8x16xf32>,
    %455 = math.exp %453 : vector<8x16xf32>
    %456 = arith.subf %455, %453 : vector<8x16xf32>
    %cst_52 = arith.constant 1.000000e+00 : f32
    %457 = vector.broadcast %cst_52 : f32 to vector<8x16xf32>
    %458 = arith.subf %456, %457 : vector<8x16xf32>
    %459 = arith.mulf %452, %452 : vector<8x16xf32>
    %460 = arith.addf %458, %459 : vector<8x16xf32>
    %461 = vector.shape_cast %460 : vector<8x16xf32> to vector<1x8x16xf32>
    %cst_53 = arith.constant dense<0.000000e+00> : vector<1xf32>
    %462 = vector.multi_reduction <add>, %461, %cst_53 [1, 2] : vector<1x8x16xf32> to vector<1xf32>
    %463 = vector.shape_cast %462 : vector<1xf32> to vector<1x1x1xf32>
    %464 = vector.extract %463[0, 0, 0] : f32 from vector<1x1x1xf32>
    %465 = vector.broadcast %464 : f32 to vector<1x1xf32>
    %cst_54 = arith.constant 5.000000e-01 : f32
    %466 = vector.broadcast %cst_54 : f32 to vector<1x1xf32>
    %467 = arith.mulf %466, %465 : vector<1x1xf32>
    %c0_55 = arith.constant 0 : index
    %c0_56 = arith.constant 0 : index
    %468 = vector.load %arg8[%c0_55, %c0_56] : memref<1x1xf32, #tpu.memory_space<vmem>>, vector<1x1xf32>
    tpu.vector_store %arg8[%c0_55, %c0_56], %467 {strides = array<i32>} : memref<1x1xf32, #tpu.memory_space<vmem>>, vector<1x1xf32>,
    return
  }
}

</mosaic_0001>

<bundles_post_ra>
// kernel: tpu_custom_call.1
= control target key start
LH: loop header
LB: loop body
LE: loop exit
PB: predicated region body
PF: predicated region fallthrough
CT: control target
= control target key end

     0   :  { %14 = vsyncpa [#allocation3], 0  ;;  %v2212_v2 = vmov 0   ;;  %v2213_v7 = vmov 0.0   ;;  %vm2214_vm0 = vmmov 0   ;;  %s2734_s0 = inlined_call_operand.vmem [shape: s32[128,1], index: 0, kind: input, shape index: {}]   ;;  %s2735_s1 = inlined_call_operand.vmem [shape: s32[8,1], index: 1, kind: input, shape index: {}]   ;;  %s2736_s2 = inlined_call_operand.vmem [shape: bf16[128,128], index: 2, kind: input, shape index: {}]   ;;  %s2737_s3 = inlined_call_operand.vmem [shape: bf16[32,128], index: 3, kind: input, shape index: {}]   ;;  %s2738_s4 = inlined_call_operand.vmem [shape: f32[1,128], index: 4, kind: input, shape index: {}]   ;;  %s2739_s5 = inlined_call_operand.vmem [shape: bf16[32,32], index: 5, kind: input, shape index: {}]   ;;  %s2740_s6 = inlined_call_operand.vmem [shape: f32[1,32], index: 6, kind: input, shape index: {}]   ;;  %s2741_s7 = inlined_call_operand.hbm [shape: f32[8,16], index: 7, kind: output, shape index: {0}]   ;;  %s2742_s8 = inlined_call_operand.hbm [shape: f32[1,1], index: 8, kind: output, shape index: {1}]  }
   0x1   :  { %v34_v0 = vld [vmem:[%s2734_s0 + $0x10] sm:$0xff]  ;;  %v32_v1 = vld [vmem:[%s2734_s0] sm:$0xff]  ;;  %2021 = vset.pattern.permute.xlu1 %v2212_v2  ;;  %2020 = vset.pattern.permute.xlu0 %v2212_v2  ;;  %v35_v3 = vld [vmem:[%s2734_s0 + $0x18] sm:$0xff] }
   0x2   :  { %v33_v4 = vld [vmem:[%s2734_s0 + $0x8] sm:$0xff]  ;;  %57 = vperm.xlu1 %2021, %v34_v0   ;;  %51 = vperm.xlu0 %2020, %v32_v1   ;;  %v2022_v5 = vld [vmem:[%s2736_s2 + $0x38] sm:$0xff]   ;;  %v2023_v6 = vld [vmem:[%s2736_s2 + $0x30] sm:$0xff]  }
   0x3   :  { %1872 = vmatprep.subr.bf16.mxu1 %v2213_v7  ;;  %1876 = vmatprep.mubr.msk.bf16.mxu1 %vm2214_vm0, %v2213_v7  ;;  %v2024_v8 = vld [vmem:[%s2736_s2 + $0x28] sm:$0xff]   ;;  %v2025_v10 = vld [vmem:[%s2736_s2 + $0x20] sm:$0xff]  }
   0x4   :  { %1840 = vmatprep.subr.bf16.mxu0 %v2022_v5  ;;  %v2296_v9 = vld [vmem:[%s2737_s3 + $0x8] sm:$0xff]   ;;  %v2305_v11 = vld [vmem:[%s2737_s3] sm:$0xff]  }
   0x5   :  { %1841 = vmatpush3.bf16.msra.mxu0 %v2022_v5  ;;  %1873 = vmatpush3.bf16.msra.mxu1 %v2296_v9 }
   0x6   :  { %60 = vperm.xlu1 %2021, %v35_v3   ;;  %54 = vperm.xlu0 %2020, %v33_v4  }
   0x7   :  { %1842 = vmatprep.subr.bf16.mxu0 %v2023_v6  ;;  %1874 = vmatprep.subr.bf16.mxu1 %v2213_v7 }
   0x9   :  { %1843 = vmatpush3.bf16.msra.mxu0 %v2023_v6 }
   0xa   :  { %1844 = vmatprep.subr.bf16.mxu0 %v2024_v8 }
   0xd   :  { %1845 = vmatpush3.bf16.msra.mxu0 %v2024_v8 }
   0xe   :  { %15 = vsyncpa [#allocation5], 0  ;;  %1846 = vmatprep.subr.bf16.mxu0 %v2025_v10  ;;  %v2026_v12 = vld [vmem:[%s2736_s2 + $0x18] sm:$0xff]   ;;  %1875 = vmatpush3.bf16.msra.mxu1 %v2305_v11  ;;  %v2027_v13 = vld [vmem:[%s2736_s2 + $0x10] sm:$0xff]   ;;  %v48_v16 = vlaneseq  ;;  %v2215_v22 = vmov 1.0|1.0  }
   0xf   :  { %1880 = vmatprep.subr.bf16.mxu1 %v2213_v7  ;;  %v2029_v14 = vld [vmem:[%s2736_s2 + $0x8] sm:$0xff]   ;;  %v2031_v15 = vld [vmem:[%s2736_s2] sm:$0xff]   ;;  %s2216_s14 = smov 64   ;;  %s2217_s15 = smov 32   ;;  %vm322_vm9 = vcmask 261120  }
  0x10   :  { %v2330_v19 = vand.u32 127, %v48_v16  ;;  %v2347_v28 = vld [vmem:[%s2738_s4] ss:$0 sm:$0xff] }
  0x11   :  { %1847 = vmatpush3.bf16.msra.mxu0 %v2025_v10  ;;  %1877 = vmatmul.mubr.bf16.vlgmr.msra.gmra.mxu1 %v2212_v2  ;;  %v2353_v32 = vld [vmem:[%s2735_s1] sm:$0xff] }
  0x12   :  { %1848 = vmatprep.subr.bf16.mxu0 %v2026_v12  ;;  %1881 = vmatpush3.bf16.msra.mxu1 %v2296_v9  ;;  %vm390_vm7 = vcmp.gt.s32.totalorder %v2353_v32, 0  ;;  %vm469_vm10 = vcmp.gt.s32.totalorder %v2353_v32, 1  ;;  %vm548_vm12 = vcmp.gt.s32.totalorder %v2353_v32, 2  ;;  %vm627_vm14 = vcmp.gt.s32.totalorder %v2353_v32, 3 }
  0x13   :  { %1882 = vmatprep.subr.bf16.mxu1 %v2213_v7  ;;  %1884 = vmatprep.mubr.msk.bf16.mxu1 %vm2214_vm0, %v2213_v7  ;;  %v391_v34 = vsel %vm390_vm7, 1, %v2212_v2  ;;  %v470_v60 = vsel %vm469_vm10, 1, %v2212_v2  ;;  %vm706_vm7 = vcmp.gt.s32.totalorder %v2353_v32, 4  ;;  %vm785_vm10 = vcmp.gt.s32.totalorder %v2353_v32, 5 }
  0x15   :  { %1849 = vmatpush3.bf16.msra.mxu0 %v2026_v12 }
  0x16   :  { %1850 = vmatprep.subr.bf16.mxu0 %v2027_v13  ;;  %1883 = vmatpush3.bf16.msra.mxu1 %v2305_v11 }
  0x17   :  { %1888 = vmatprep.subr.bf16.mxu1 %v2213_v7 }
  0x19   :  { %1851 = vmatpush3.bf16.msra.mxu0 %v2027_v13 }
  0x1a   :  { %1852 = vmatprep.subr.bf16.mxu0 %v2029_v14 }
  0x1d   :  { %1853 = vmatpush3.bf16.msra.mxu0 %v2029_v14 }
  0x1e   :  { %1854 = vmatprep.subr.bf16.mxu0 %v2031_v15 }
  0x21   :  { %1855 = vmatpush3.bf16.msra.mxu0 %v2031_v15 }
  0x22   :  { %1928 = vmatprep.subr.bf16.mxu0 %v2213_v7 }
  0x7d   :  { %v58_v17 = vpop.permute.xlu1 %57  ;;  %v52_v18 = vpop.permute.xlu0 %51 }
  0x7e   :  { %vm100_vm1 = vcmp.eq.s32.totalorder %v58_v17, %v2330_v19  ;;  %vm98_vm5 = vcmp.eq.s32.totalorder %v52_v18, %v2330_v19 }
  0x81   :  { %v61_v20 = vpop.permute.xlu1 %60  ;;  %v55_v21 = vpop.permute.xlu0 %54 }
  0x82   :  { %vm101_vm2 = vcmp.eq.s32.totalorder %v61_v20, %v2330_v19  ;;  %vm99_vm3 = vcmp.eq.s32.totalorder %v55_v21, %v2330_v19 }
  0x83   :  { %vm1721_vm4 = vmpackc.low %vm101_vm2, %vm100_vm1 }
  0x84   :  { %vm1719_vm6 = vmpackc.low %vm99_vm3, %vm98_vm5 }
  0x85   :  { %1856 = vmatprep.mubr.msk.bf16.mxu0 %vm1719_vm6, %v2215_v22 }
  0x86   :  { %1857 = vmatmul.mubr.msk.bf16.vlgmr.msra.gmra.mxu0 %vm1721_vm4, %v2215_v22 }
  0x87   :  { %1929 = vmatpush3.bf16.msra.mxu0 %v2296_v9 }
  0x88   :  { %1930 = vmatprep.subr.bf16.mxu0 %v2213_v7 }
  0x8b   :  { %1931 = vmatpush3.bf16.msra.mxu0 %v2305_v11 }
  0x8c   :  { %1944 = vmatprep.subr.bf16.mxu0 %v2213_v7 }
  0xd1   :  { %v360_v23 = vpop.f32.mrf.mxu1 }
  0xd3   :  { %v1878_v24 = vpop.f32.mrf.mxu1 }
  0xd5   :  { %v363_v25 = vpop.f32.mrf.mxu1 }
  0xd7   :  { %v1879_v26 = vpop.f32.mrf.mxu1 }
 0x146   :  { %v2342_v27 = vpop.f32.mrf.mxu0 }
 0x147   :  { %v252_v18 = vadd.f32 %v2342_v27, %v2347_v28 }
 0x148   :  { %v243_v29 = vpop.f32.mrf.mxu0 }
 0x149   :  { %v244_v30 = vadd.f32 %v2347_v28, %v243_v29  ;;  %v549_v29 = vsel %vm548_vm12, 1, %v2212_v2  ;;  %vm864_vm12 = vcmp.gt.s32.totalorder %v2353_v32, 6 }
 0x14a   :  { %v2369_v51 = vpop.f32.mrf.mxu0 }
 0x14b   :  { %v361_v31 = vadd.f32 %v360_v23, %v244_v30 }
 0x14c   :  { %v246_v52 = vpop.f32.mrf.mxu0 }
 0x14d   :  { %2034 = vtanh.f32 %v361_v31  ;;  %v1737_v35 = vmul.f32 -1.442695, %v361_v31  ;;  %v247_v53 = vadd.f32 %v2347_v28, %v246_v52 }
 0x14f   :  { %2036 = vpow2.f32 %v1737_v35 }
 0x15a   :  { %v2035_v33 = vpop.eup %2034 }
 0x15b   :  { %375 = vrot.lane.b32.xlu0 %v2035_v33, %s2216_s14 }
 0x15c   :  { %v2037_v36 = vpop.eup %2036 }
 0x15d   :  { %v369_v37 = vadd.f32 1.0, %v2037_v36 }
 0x15f   :  { %393 = vperm.xlu0 %2020, %v391_v34   ;;  %2038 = vrcp.f32 %v369_v37 }
 0x16c   :  { %v2039_v38 = vpop.eup %2038 }
 0x16d   :  { %v373_v41 = vmul.f32 0.0, %v2039_v38 }
 0x1cd   :  { %v376_v39 = vpop.permute.xlu0 %375 }
 0x1ce   :  { %v378_v40 = vmul.f32 %v2039_v38, %v376_v39 }
 0x1d0   :  { %380 = vrot.lane.b32.xlu1 %v378_v40, %s2217_s15 }
 0x1da   :  { %v394_v45 = vpop.permute.xlu0 %393 }
 0x1db   :  { %vm395_vm8 = vcmp.eq.s32.totalorder %v394_v45, 1 }
 0x242   :  { %v381_v42 = vpop.permute.xlu1 %380 }
 0x243   :  { %v383_v43 = vadd.f32 %v381_v42, %v373_v41 }
 0x245   :  { %2040 = vtanh.f32 %v383_v43  ;;  %v397_v4 = vsel %vm395_vm8, %v383_v43, 0.0 }
 0x252   :  { %v2041_v44 = vpop.eup %2040 }
 0x253   :  { %386 = vrot.lane.b32.xlu1 %v2041_v44, %s2216_s14 }
 0x2c5   :  { %v387_v46 = vpop.permute.xlu1 %386 }
 0x2c6   :  { %v389_v47 = vmul.f32 %v2039_v38, %v387_v46 }
 0x2c8   :  { %v396_v48 = vsel %vm395_vm8, %v389_v47, 0.0  ;;  %v255_v47 = vadd.f32 %v2369_v51, %v2347_v28  ;;  %v38_v51 = vld [vmem:[%s2734_s0 + $0x30] sm:$0xff] }
 0x2c9   :  { %v398_v49 = vpack.c.bf16 %v396_v48, %v396_v48 }
 0x2cb   :  { %400 = vrot.lane.b32.xlu0 %v398_v49, %s2217_s15 }
 0x33d   :  { %v401_v50 = vpop.permute.xlu0 %400 }
 0x33e   :  { %1885 = vmatmul.mubr.msk.bf16.vlgmr.msra.gmra.mxu1 %vm322_vm9, %v401_v50 }
 0x33f   :  { %1889 = vmatpush3.bf16.msra.mxu1 %v2296_v9  ;;  %1892 = vmatprep.mubr.msk.bf16.mxu1 %vm2214_vm0, %v2213_v7 }
 0x340   :  { %1890 = vmatprep.subr.bf16.mxu1 %v2213_v7 }
 0x343   :  { %1891 = vmatpush3.bf16.msra.mxu1 %v2305_v11 }
 0x344   :  { %1896 = vmatprep.subr.bf16.mxu1 %v2213_v7 }
 0x3fe   :  { %v439_v54 = vpop.f32.mrf.mxu1 }
 0x3ff   :  { %v440_v55 = vadd.f32 %v439_v54, %v247_v53 }
 0x400   :  { %v1886_v56 = vpop.f32.mrf.mxu1 }
 0x401   :  { %2042 = vtanh.f32 %v440_v55  ;;  %v1739_v61 = vmul.f32 -1.442695, %v440_v55  ;;  %v628_v55 = vsel %vm627_vm14, 1, %v2212_v2  ;;  %v36_v56 = vld [vmem:[%s2734_s0 + $0x20] sm:$0xff] }
 0x402   :  { %v442_v57 = vpop.f32.mrf.mxu1 }
 0x403   :  { %2044 = vpow2.f32 %v1739_v61 }
 0x404   :  { %v1887_v58 = vpop.f32.mrf.mxu1 }
 0x40e   :  { %v2043_v59 = vpop.eup %2042 }
 0x40f   :  { %454 = vrot.lane.b32.xlu1 %v2043_v59, %s2216_s14 }
 0x410   :  { %v2045_v62 = vpop.eup %2044 }
 0x411   :  { %v448_v63 = vadd.f32 1.0, %v2045_v62 }
 0x413   :  { %472 = vperm.xlu1 %2021, %v470_v60   ;;  %2046 = vrcp.f32 %v448_v63 }
 0x420   :  { %v2047_v0 = vpop.eup %2046 }
 0x421   :  { %v452_v5 = vmul.f32 %v2047_v0, %v397_v4 }
 0x481   :  { %v455_v1 = vpop.permute.xlu1 %454 }
 0x482   :  { %v457_v3 = vmul.f32 %v2047_v0, %v455_v1 }
 0x484   :  { %459 = vrot.lane.b32.xlu0 %v457_v3, %s2217_s15 }
 0x48e   :  { %v473_v12 = vpop.permute.xlu1 %472 }
 0x48f   :  { %vm474_vm11 = vcmp.eq.s32.totalorder %v473_v12, 1 }
 0x4f6   :  { %v460_v6 = vpop.permute.xlu0 %459 }
 0x4f7   :  { %v462_v8 = vadd.f32 %v460_v6, %v452_v5  ;;  %v37_v5 = vld [vmem:[%s2734_s0 + $0x28] sm:$0xff]  ;;  %v39_v6 = vld [vmem:[%s2734_s0 + $0x38] sm:$0xff] }
 0x4f9   :  { %2048 = vtanh.f32 %v462_v8  ;;  %v476_v36 = vsel %vm474_vm11, %v462_v8, %v397_v4 }
 0x506   :  { %v2049_v10 = vpop.eup %2048 }
 0x507   :  { %465 = vrot.lane.b32.xlu0 %v2049_v10, %s2216_s14 }
 0x579   :  { %v466_v13 = vpop.permute.xlu0 %465 }
 0x57a   :  { %v468_v14 = vmul.f32 %v2047_v0, %v466_v13 }
 0x57c   :  { %v475_v15 = vsel %vm474_vm11, %v468_v14, %v396_v48 }
 0x57d   :  { %v477_v16 = vpack.c.bf16 %v475_v15, %v475_v15 }
 0x57f   :  { %479 = vrot.lane.b32.xlu1 %v477_v16, %s2217_s15 }
 0x5f1   :  { %v480_v17 = vpop.permute.xlu1 %479 }
 0x5f2   :  { %1893 = vmatmul.mubr.msk.bf16.vlgmr.msra.gmra.mxu1 %vm322_vm9, %v480_v17 }
 0x5f3   :  { %1897 = vmatpush3.bf16.msra.mxu1 %v2296_v9  ;;  %1900 = vmatprep.mubr.msk.bf16.mxu1 %vm2214_vm0, %v2213_v7 }
 0x5f4   :  { %1898 = vmatprep.subr.bf16.mxu1 %v2213_v7 }
 0x5f7   :  { %1899 = vmatpush3.bf16.msra.mxu1 %v2305_v11 }
 0x5f8   :  { %1904 = vmatprep.subr.bf16.mxu1 %v2213_v7 }
 0x6b2   :  { %v518_v20 = vpop.f32.mrf.mxu1 }
 0x6b3   :  { %v519_v21 = vadd.f32 %v518_v20, %v252_v18 }
 0x6b4   :  { %v1894_v23 = vpop.f32.mrf.mxu1 }
 0x6b5   :  { %2050 = vtanh.f32 %v519_v21  ;;  %v1741_v30 = vmul.f32 -1.442695, %v519_v21 }
 0x6b6   :  { %v521_v24 = vpop.f32.mrf.mxu1 }
 0x6b7   :  { %2052 = vpow2.f32 %v1741_v30 }
 0x6b8   :  { %v1895_v25 = vpop.f32.mrf.mxu1 }
 0x6c2   :  { %v2051_v26 = vpop.eup %2050 }
 0x6c3   :  { %533 = vrot.lane.b32.xlu0 %v2051_v26, %s2216_s14 }
 0x6c4   :  { %v2053_v31 = vpop.eup %2052 }
 0x6c5   :  { %v527_v33 = vadd.f32 1.0, %v2053_v31 }
 0x6c7   :  { %551 = vperm.xlu0 %2020, %v549_v29   ;;  %2054 = vrcp.f32 %v527_v33 }
 0x6d4   :  { %v2055_v27 = vpop.eup %2054 }
 0x6d5   :  { %v531_v37 = vmul.f32 %v2055_v27, %v476_v36 }
 0x735   :  { %v534_v34 = vpop.permute.xlu0 %533 }
 0x736   :  { %v536_v35 = vmul.f32 %v2055_v27, %v534_v34 }
 0x738   :  { %538 = vrot.lane.b32.xlu1 %v536_v35, %s2217_s15 }
 0x742   :  { %v552_v41 = vpop.permute.xlu0 %551 }
 0x743   :  { %vm553_vm13 = vcmp.eq.s32.totalorder %v552_v41, 1 }
 0x7aa   :  { %v539_v38 = vpop.permute.xlu1 %538 }
 0x7ab   :  { %v541_v39 = vadd.f32 %v539_v38, %v531_v37 }
 0x7ad   :  { %2056 = vtanh.f32 %v541_v39  ;;  %v555_v63 = vsel %vm553_vm13, %v541_v39, %v476_v36 }
 0x7ba   :  { %v2057_v40 = vpop.eup %2056 }
 0x7bb   :  { %544 = vrot.lane.b32.xlu1 %v2057_v40, %s2216_s14 }
 0x82d   :  { %v545_v42 = vpop.permute.xlu1 %544 }
 0x82e   :  { %v547_v43 = vmul.f32 %v2055_v27, %v545_v42  ;;  %v707_v27 = vsel %vm706_vm7, 1, %v2212_v2 }
 0x830   :  { %v554_v44 = vsel %vm553_vm13, %v547_v43, %v475_v15 }
 0x831   :  { %v556_v45 = vpack.c.bf16 %v554_v44, %v554_v44 }
 0x833   :  { %558 = vrot.lane.b32.xlu0 %v556_v45, %s2217_s15 }
 0x8a5   :  { %v559_v46 = vpop.permute.xlu0 %558 }
 0x8a6   :  { %1901 = vmatmul.mubr.msk.bf16.vlgmr.msra.gmra.mxu1 %vm322_vm9, %v559_v46 }
 0x8a7   :  { %1905 = vmatpush3.bf16.msra.mxu1 %v2296_v9  ;;  %1908 = vmatprep.mubr.msk.bf16.mxu1 %vm2214_vm0, %v2213_v7 }
 0x8a8   :  { %1906 = vmatprep.subr.bf16.mxu1 %v2213_v7 }
 0x8ab   :  { %1907 = vmatpush3.bf16.msra.mxu1 %v2305_v11 }
 0x8ac   :  { %1912 = vmatprep.subr.bf16.mxu1 %v2213_v7 }
 0x966   :  { %v597_v48 = vpop.f32.mrf.mxu1 }
 0x967   :  { %v598_v49 = vadd.f32 %v597_v48, %v255_v47 }
 0x968   :  { %v1902_v50 = vpop.f32.mrf.mxu1 }
 0x969   :  { %2058 = vtanh.f32 %v598_v49  ;;  %v1743_v57 = vmul.f32 -1.442695, %v598_v49 }
 0x96a   :  { %v600_v52 = vpop.f32.mrf.mxu1 }
 0x96b   :  { %2060 = vpow2.f32 %v1743_v57 }
 0x96c   :  { %v1903_v53 = vpop.f32.mrf.mxu1 }
 0x976   :  { %v2059_v54 = vpop.eup %2058 }
 0x977   :  { %612 = vrot.lane.b32.xlu1 %v2059_v54, %s2216_s14 }
 0x978   :  { %v2061_v58 = vpop.eup %2060 }
 0x979   :  { %v606_v59 = vadd.f32 1.0, %v2061_v58 }
 0x97b   :  { %630 = vperm.xlu1 %2021, %v628_v55   ;;  %2062 = vrcp.f32 %v606_v59 }
 0x97f   :  { %63 = vperm.xlu1 %2021, %v36_v56  }
 0x983   :  { %69 = vperm.xlu1 %2021, %v38_v51  }
 0x988   :  { %v2063_v60 = vpop.eup %2062 }
 0x989   :  { %v610_v0 = vmul.f32 %v2063_v60, %v555_v63 }
 0x9e9   :  { %v613_v61 = vpop.permute.xlu1 %612 }
 0x9ea   :  { %v615_v62 = vmul.f32 %v2063_v60, %v613_v61 }
 0x9ec   :  { %617 = vrot.lane.b32.xlu0 %v615_v62, %s2217_s15 }
 0x9f6   :  { %v631_v8 = vpop.permute.xlu1 %630 }
 0x9f7   :  { %vm632_vm15 = vcmp.eq.s32.totalorder %v631_v8, 1 }
 0x9fa   :  { %v64_v15 = vpop.permute.xlu1 %63 }
 0x9fb   :  { %vm102_vm1 = vcmp.eq.s32.totalorder %v64_v15, %v2330_v19 }
 0x9fe   :  { %v70_v17 = vpop.permute.xlu1 %69 }
 0x9ff   :  { %vm104_vm4 = vcmp.eq.s32.totalorder %v70_v17, %v2330_v19 }
 0xa5e   :  { %v618_v1 = vpop.permute.xlu0 %617 }
 0xa5f   :  { %v620_v3 = vadd.f32 %v618_v1, %v610_v0 }
 0xa61   :  { %2064 = vtanh.f32 %v620_v3  ;;  %v634_v40 = vsel %vm632_vm15, %v620_v3, %v555_v63 }
 0xa6e   :  { %v2065_v4 = vpop.eup %2064 }
 0xa6f   :  { %623 = vrot.lane.b32.xlu0 %v2065_v4, %s2216_s14 }
 0xa73   :  { %66 = vperm.xlu0 %2020, %v37_v5  }
 0xa77   :  { %72 = vperm.xlu0 %2020, %v39_v6  }
 0xae1   :  { %v624_v10 = vpop.permute.xlu0 %623 }
 0xae2   :  { %v626_v12 = vmul.f32 %v2063_v60, %v624_v10  ;;  %v786_v60 = vsel %vm785_vm10, 1, %v2212_v2 }
 0xae4   :  { %v633_v13 = vsel %vm632_vm15, %v626_v12, %v554_v44 }
 0xae5   :  { %v635_v14 = vpack.c.bf16 %v633_v13, %v633_v13 }
 0xae7   :  { %637 = vrot.lane.b32.xlu1 %v635_v14, %s2217_s15 }
 0xaee   :  { %v67_v16 = vpop.permute.xlu0 %66 }
 0xaef   :  { %vm103_vm2 = vcmp.eq.s32.totalorder %v67_v16, %v2330_v19 }
 0xaf0   :  { %vm1723_vm3 = vmpackc.low %vm103_vm2, %vm102_vm1 }
 0xaf1   :  { %1860 = vmatprep.mubr.msk.bf16.mxu0 %vm1723_vm3, %v2215_v22 }
 0xaf2   :  { %v73_v18 = vpop.permute.xlu0 %72 }
 0xaf3   :  { %vm105_vm5 = vcmp.eq.s32.totalorder %v73_v18, %v2330_v19 }
 0xaf4   :  { %vm1725_vm6 = vmpackc.low %vm105_vm5, %vm104_vm4 }
 0xaf5   :  { %1861 = vmatmul.mubr.msk.bf16.gmra.mxu0 %vm1725_vm6, %v2215_v22 }
 0xb59   :  { %v638_v20 = vpop.permute.xlu1 %637 }
 0xb5a   :  { %1909 = vmatmul.mubr.msk.bf16.vlgmr.msra.gmra.mxu1 %vm322_vm9, %v638_v20 }
 0xb5b   :  { %1913 = vmatpush3.bf16.msra.mxu1 %v2296_v9  ;;  %1916 = vmatprep.mubr.msk.bf16.mxu1 %vm2214_vm0, %v2213_v7 }
 0xb5c   :  { %1914 = vmatprep.subr.bf16.mxu1 %v2213_v7 }
 0xb5f   :  { %1915 = vmatpush3.bf16.msra.mxu1 %v2305_v11 }
 0xb60   :  { %1920 = vmatprep.subr.bf16.mxu1 %v2213_v7 }
 0xbb5   :  { %v2439_v21 = vpop.f32.mrf.mxu0 }
 0xbb6   :  { %v268_v18 = vadd.f32 %v2439_v21, %v2347_v28  ;;  %v42_v21 = vld [vmem:[%s2734_s0 + $0x50] sm:$0xff] }
 0xbb7   :  { %v259_v23 = vpop.f32.mrf.mxu0 }
 0xbb8   :  { %v260_v24 = vadd.f32 %v2347_v28, %v259_v23 }
 0xbb9   :  { %v2457_v52 = vpop.f32.mrf.mxu0 }
 0xbbb   :  { %v262_v53 = vpop.f32.mrf.mxu0 }
 0xbbc   :  { %v263_v54 = vadd.f32 %v2347_v28, %v262_v53 }
 0xc1a   :  { %v676_v25 = vpop.f32.mrf.mxu1 }
 0xc1b   :  { %v677_v26 = vadd.f32 %v676_v25, %v260_v24 }
 0xc1c   :  { %v1910_v29 = vpop.f32.mrf.mxu1 }
 0xc1d   :  { %2066 = vtanh.f32 %v677_v26  ;;  %v1745_v34 = vmul.f32 -1.442695, %v677_v26 }
 0xc1e   :  { %v679_v30 = vpop.f32.mrf.mxu1 }
 0xc1f   :  { %2068 = vpow2.f32 %v1745_v34  ;;  %v865_v30 = vsel %vm864_vm12, 1, %v2212_v2  ;;  %vm943_vm12 = vcmp.gt.s32.totalorder %v2353_v32, 7 }
 0xc20   :  { %v1911_v31 = vpop.f32.mrf.mxu1 }
 0xc21   :  { %v40_v31 = vld [vmem:[%s2734_s0 + $0x40] sm:$0xff] }
 0xc2a   :  { %v2067_v33 = vpop.eup %2066 }
 0xc2b   :  { %691 = vrot.lane.b32.xlu0 %v2067_v33, %s2216_s14  ;;  %v44_v33 = vld [vmem:[%s2734_s0 + $0x60] sm:$0xff] }
 0xc2c   :  { %v2069_v35 = vpop.eup %2068 }
 0xc2d   :  { %v685_v36 = vadd.f32 1.0, %v2069_v35 }
 0xc2f   :  { %709 = vperm.xlu0 %2020, %v707_v27   ;;  %2070 = vrcp.f32 %v685_v36  ;;  %v46_v27 = vld [vmem:[%s2734_s0 + $0x70] sm:$0xff] }
 0xc3c   :  { %v2071_v37 = vpop.eup %2070 }
 0xc3d   :  { %v689_v41 = vmul.f32 %v2071_v37, %v634_v40 }
 0xc9d   :  { %v692_v38 = vpop.permute.xlu0 %691 }
 0xc9e   :  { %v694_v39 = vmul.f32 %v2071_v37, %v692_v38 }
 0xca0   :  { %696 = vrot.lane.b32.xlu1 %v694_v39, %s2217_s15 }
 0xcaa   :  { %v710_v45 = vpop.permute.xlu0 %709 }
 0xcab   :  { %vm711_vm8 = vcmp.eq.s32.totalorder %v710_v45, 1  ;;  %v41_v45 = vld [vmem:[%s2734_s0 + $0x48] sm:$0xff] }
 0xd12   :  { %v697_v42 = vpop.permute.xlu1 %696 }
 0xd13   :  { %v699_v43 = vadd.f32 %v697_v42, %v689_v41 }
 0xd15   :  { %2072 = vtanh.f32 %v699_v43  ;;  %v713_v4 = vsel %vm711_vm8, %v699_v43, %v634_v40 }
 0xd22   :  { %v2073_v44 = vpop.eup %2072 }
 0xd23   :  { %702 = vrot.lane.b32.xlu1 %v2073_v44, %s2216_s14 }
 0xd95   :  { %v703_v46 = vpop.permute.xlu1 %702 }
 0xd96   :  { %v705_v47 = vmul.f32 %v2071_v37, %v703_v46  ;;  %v43_v46 = vld [vmem:[%s2734_s0 + $0x58] sm:$0xff] }
 0xd98   :  { %v712_v48 = vsel %vm711_vm8, %v705_v47, %v633_v13  ;;  %v45_v47 = vld [vmem:[%s2734_s0 + $0x68] sm:$0xff] }
 0xd99   :  { %v714_v49 = vpack.c.bf16 %v712_v48, %v712_v48 }
 0xd9b   :  { %716 = vrot.lane.b32.xlu0 %v714_v49, %s2217_s15 }
 0xe0d   :  { %v717_v50 = vpop.permute.xlu0 %716 }
 0xe0e   :  { %1917 = vmatmul.mubr.msk.bf16.vlgmr.msra.gmra.mxu1 %vm322_vm9, %v717_v50 }
 0xe0f   :  { %1921 = vmatpush3.bf16.msra.mxu1 %v2296_v9  ;;  %1924 = vmatprep.mubr.msk.bf16.mxu1 %vm2214_vm0, %v2213_v7 }
 0xe10   :  { %1922 = vmatprep.subr.bf16.mxu1 %v2213_v7 }
 0xe13   :  { %1923 = vmatpush3.bf16.msra.mxu1 %v2305_v11 }
 0xe14   :  { %1936 = vmatprep.subr.bf16.mxu1 %v2213_v7 }
 0xece   :  { %v755_v55 = vpop.f32.mrf.mxu1 }
 0xecf   :  { %v756_v56 = vadd.f32 %v755_v55, %v263_v54 }
 0xed0   :  { %v1918_v51 = vpop.f32.mrf.mxu1 }
 0xed1   :  { %2074 = vtanh.f32 %v756_v56  ;;  %v1747_v61 = vmul.f32 -1.442695, %v756_v56 }
 0xed2   :  { %v758_v57 = vpop.f32.mrf.mxu1 }
 0xed3   :  { %2076 = vpow2.f32 %v1747_v61 }
 0xed4   :  { %v1919_v58 = vpop.f32.mrf.mxu1 }
 0xede   :  { %v2075_v59 = vpop.eup %2074 }
 0xedf   :  { %770 = vrot.lane.b32.xlu1 %v2075_v59, %s2216_s14 }
 0xee0   :  { %v2077_v62 = vpop.eup %2076 }
 0xee1   :  { %v764_v63 = vadd.f32 1.0, %v2077_v62 }
 0xee3   :  { %788 = vperm.xlu1 %2021, %v786_v60   ;;  %2078 = vrcp.f32 %v764_v63 }
 0xef0   :  { %v2079_v0 = vpop.eup %2078 }
 0xef1   :  { %v768_v5 = vmul.f32 %v2079_v0, %v713_v4 }
 0xf51   :  { %v771_v1 = vpop.permute.xlu1 %770 }
 0xf52   :  { %v773_v3 = vmul.f32 %v2079_v0, %v771_v1 }
 0xf54   :  { %775 = vrot.lane.b32.xlu0 %v773_v3, %s2217_s15 }
 0xf5e   :  { %v789_v12 = vpop.permute.xlu1 %788 }
 0xf5f   :  { %vm790_vm11 = vcmp.eq.s32.totalorder %v789_v12, 1 }
 0xfc6   :  { %v776_v6 = vpop.permute.xlu0 %775 }
 0xfc7   :  { %v778_v8 = vadd.f32 %v776_v6, %v768_v5 }
 0xfc9   :  { %2080 = vtanh.f32 %v778_v8  ;;  %v2494_v40 = vsel %vm790_vm11, %v778_v8, %v713_v4  ;;  %v271_v8 = vadd.f32 %v2457_v52, %v2347_v28 }
 0xfd6   :  { %v2081_v10 = vpop.eup %2080 }
 0xfd7   :  { %781 = vrot.lane.b32.xlu0 %v2081_v10, %s2216_s14 }
0x1049   :  { %v782_v13 = vpop.permute.xlu0 %781 }
0x104a   :  { %v784_v14 = vmul.f32 %v2079_v0, %v782_v13 }
0x104c   :  { %v791_v15 = vsel %vm790_vm11, %v784_v14, %v712_v48  ;;  %v47_v48 = vld [vmem:[%s2734_s0 + $0x78] sm:$0xff] }
0x104d   :  { %v793_v16 = vpack.c.bf16 %v791_v15, %v791_v15 }
0x104f   :  { %795 = vrot.lane.b32.xlu1 %v793_v16, %s2217_s15 }
0x10c1   :  { %v796_v17 = vpop.permute.xlu1 %795 }
0x10c2   :  { %1925 = vmatmul.mubr.msk.bf16.vlgmr.msra.gmra.mxu1 %vm322_vm9, %v796_v17  ;;  %v944_v17 = vsel %vm943_vm12, 1, %v2212_v2 }
0x10c3   :  { %1937 = vmatpush3.bf16.msra.mxu1 %v2296_v9  ;;  %1940 = vmatprep.mubr.msk.bf16.mxu1 %vm2214_vm0, %v2213_v7 }
0x10c4   :  { %1938 = vmatprep.subr.bf16.mxu1 %v2213_v7 }
0x10c7   :  { %1939 = vmatpush3.bf16.msra.mxu1 %v2305_v11 }
0x10c8   :  { %1952 = vmatprep.subr.bf16.mxu1 %v2213_v7 }
0x1182   :  { %v834_v20 = vpop.f32.mrf.mxu1 }
0x1183   :  { %v835_v23 = vadd.f32 %v834_v20, %v268_v18 }
0x1184   :  { %v1926_v24 = vpop.f32.mrf.mxu1 }
0x1185   :  { %2082 = vtanh.f32 %v835_v23  ;;  %v1749_v34 = vmul.f32 -1.442695, %v835_v23 }
0x1186   :  { %v837_v25 = vpop.f32.mrf.mxu1 }
0x1187   :  { %2084 = vpow2.f32 %v1749_v34 }
0x1188   :  { %v1927_v26 = vpop.f32.mrf.mxu1 }
0x1192   :  { %v2083_v29 = vpop.eup %2082 }
0x1193   :  { %849 = vrot.lane.b32.xlu0 %v2083_v29, %s2216_s14 }
0x1194   :  { %v2085_v35 = vpop.eup %2084 }
0x1195   :  { %v843_v36 = vadd.f32 1.0, %v2085_v35 }
0x1197   :  { %867 = vperm.xlu0 %2020, %v865_v30   ;;  %2086 = vrcp.f32 %v843_v36 }
0x119b   :  { %75 = vperm.xlu0 %2020, %v40_v31  }
0x119f   :  { %81 = vperm.xlu0 %2020, %v42_v21  }
0x11a3   :  { %87 = vperm.xlu0 %2020, %v44_v33  }
0x11a4   :  { %v2087_v37 = vpop.eup %2086 }
0x11a5   :  { %v847_v41 = vmul.f32 %v2087_v37, %v2494_v40 }
0x11a7   :  { %93 = vperm.xlu0 %2020, %v46_v27  }
0x1205   :  { %v850_v38 = vpop.permute.xlu0 %849 }
0x1206   :  { %v852_v39 = vmul.f32 %v2087_v37, %v850_v38 }
0x1208   :  { %854 = vrot.lane.b32.xlu1 %v852_v39, %s2217_s15 }
0x1212   :  { %v2513_v49 = vpop.permute.xlu0 %867 }
0x1213   :  { %vm869_vm13 = vcmp.eq.s32.totalorder %v2513_v49, 1 }
0x1216   :  { %v76_v56 = vpop.permute.xlu0 %75 }
0x1217   :  { %vm106_vm14 = vcmp.eq.s32.totalorder %v76_v56, %v2330_v19 }
0x121a   :  { %v82_v51 = vpop.permute.xlu0 %81 }
0x121b   :  { %vm108_vm2 = vcmp.eq.s32.totalorder %v82_v51, %v2330_v19 }
0x121e   :  { %v88_v58 = vpop.permute.xlu0 %87 }
0x121f   :  { %vm110_vm5 = vcmp.eq.s32.totalorder %v88_v58, %v2330_v19 }
0x1222   :  { %v94_v61 = vpop.permute.xlu0 %93 }
0x1223   :  { %vm112_vm8 = vcmp.eq.s32.totalorder %v94_v61, %v2330_v19 }
0x127a   :  { %v855_v42 = vpop.permute.xlu1 %854 }
0x127b   :  { %v2497_v43 = vadd.f32 %v855_v42, %v847_v41 }
0x127d   :  { %2088 = vtanh.f32 %v2497_v43  ;;  %v871_v26 = vsel %vm869_vm13, %v2497_v43, %v2494_v40 }
0x128a   :  { %v2089_v44 = vpop.eup %2088 }
0x128b   :  { %860 = vrot.lane.b32.xlu1 %v2089_v44, %s2216_s14 }
0x128f   :  { %78 = vperm.xlu1 %2021, %v41_v45  }
0x1293   :  { %84 = vperm.xlu1 %2021, %v43_v46  }
0x1297   :  { %90 = vperm.xlu1 %2021, %v45_v47  }
0x129b   :  { %96 = vperm.xlu1 %2021, %v47_v48  }
0x12fd   :  { %v861_v50 = vpop.permute.xlu1 %860 }
0x12fe   :  { %v863_v53 = vmul.f32 %v2087_v37, %v861_v50 }
0x1300   :  { %v2518_v54 = vsel %vm869_vm13, %v863_v53, %v791_v15  ;;  %vm1022_vm13 = vcmp.gt.s32.totalorder %v2353_v32, 8 }
0x1301   :  { %v872_v55 = vpack.c.bf16 %v2518_v54, %v2518_v54  ;;  %v1023_v44 = vsel %vm1022_vm13, 1, %v2212_v2 }
0x1303   :  { %874 = vrot.lane.b32.xlu0 %v872_v55, %s2217_s15 }
0x130a   :  { %v79_v57 = vpop.permute.xlu1 %78 }
0x130b   :  { %vm107_vm15 = vcmp.eq.s32.totalorder %v79_v57, %v2330_v19 }
0x130c   :  { %vm1727_vm1 = vmpackc.low %vm107_vm15, %vm106_vm14 }
0x130d   :  { %1864 = vmatprep.mubr.msk.bf16.mxu0 %vm1727_vm1, %v2215_v22  ;;  %vm1101_vm1 = vcmp.gt.s32.totalorder %v2353_v32, 9 }
0x130e   :  { %v85_v59 = vpop.permute.xlu1 %84 }
0x130f   :  { %vm109_vm3 = vcmp.eq.s32.totalorder %v85_v59, %v2330_v19 }
0x1310   :  { %vm1729_vm4 = vmpackc.low %vm109_vm3, %vm108_vm2  ;;  %vm1180_vm3 = vcmp.gt.s32.totalorder %v2353_v32, 10 }
0x1311   :  { %1865 = vmatmul.mubr.msk.bf16.gmra.mxu0 %vm1729_vm4, %v2215_v22 }
0x1312   :  { %v91_v60 = vpop.permute.xlu1 %90 }
0x1313   :  { %vm111_vm6 = vcmp.eq.s32.totalorder %v91_v60, %v2330_v19 }
0x1314   :  { %vm1731_vm7 = vmpackc.low %vm111_vm6, %vm110_vm5 }
0x1315   :  { %1868 = vmatprep.mubr.msk.bf16.mxu0 %vm1731_vm7, %v2215_v22 }
0x1316   :  { %v97_v62 = vpop.permute.xlu1 %96 }
0x1317   :  { %vm113_vm10 = vcmp.eq.s32.totalorder %v97_v62, %v2330_v19 }
0x1318   :  { %vm1733_vm11 = vmpackc.low %vm113_vm10, %vm112_vm8 }
0x1319   :  { %1869 = vmatmul.mubr.msk.bf16.gmra.mxu0 %vm1733_vm11, %v2215_v22 }
0x131a   :  { %1932 = vmatprep.mubr.msk.bf16.mxu0 %vm2214_vm0, %v2213_v7 }
0x1375   :  { %v875_v63 = vpop.permute.xlu0 %874 }
0x1376   :  { %1933 = vmatmul.mubr.msk.bf16.vlgmr.msra.gmra.mxu0 %vm322_vm9, %v875_v63  ;;  %v2592_v63 = vld [vmem:[%s2737_s3 + $0x8] sm:$0xff]  }
0x1377   :  { %1945 = vmatpush3.bf16.msra.mxu0 %v2296_v9  ;;  %1948 = vmatprep.mubr.msk.bf16.mxu0 %vm2214_vm0, %v2213_v7 }
0x1378   :  { %1946 = vmatprep.subr.bf16.mxu0 %v2213_v7 }
0x137b   :  { %1947 = vmatpush3.bf16.msra.mxu0 %v2305_v11 }
0x137c   :  { %1960 = vmatprep.subr.bf16.mxu0 %v2213_v7 }
0x13d1   :  { %v2544_v19 = vpop.f32.mrf.mxu0 }
0x13d3   :  { %v275_v22 = vpop.f32.mrf.mxu0 }
0x13d4   :  { %v276_v38 = vadd.f32 %v2347_v28, %v275_v22 }
0x13d5   :  { %v2546_v0 = vpop.f32.mrf.mxu0 }
0x13d7   :  { %v2548_v1 = vpop.f32.mrf.mxu0 }
0x13d8   :  { %v279_v22 = vadd.f32 %v2347_v28, %v2548_v1 }
0x13d9   :  { %v2550_v3 = vpop.f32.mrf.mxu0 }
0x13db   :  { %v2552_v4 = vpop.f32.mrf.mxu0 }
0x13dd   :  { %v2554_v5 = vpop.f32.mrf.mxu0 }
0x13df   :  { %v2556_v6 = vpop.f32.mrf.mxu0 }
0x1436   :  { %v913_v10 = vpop.f32.mrf.mxu0 }
0x1437   :  { %v914_v12 = vadd.f32 %v913_v10, %v271_v8 }
0x1438   :  { %v1934_v13 = vpop.f32.mrf.mxu0 }
0x1439   :  { %2090 = vtanh.f32 %v914_v12  ;;  %v1751_v18 = vmul.f32 -1.442695, %v914_v12 }
0x143a   :  { %v916_v14 = vpop.f32.mrf.mxu0 }
0x143b   :  { %2092 = vpow2.f32 %v1751_v18 }
0x143c   :  { %v1935_v15 = vpop.f32.mrf.mxu0 }
0x1446   :  { %v2091_v16 = vpop.eup %2090 }
0x1447   :  { %928 = vrot.lane.b32.xlu1 %v2091_v16, %s2216_s14  ;;  %v1102_v16 = vsel %vm1101_vm1, 1, %v2212_v2 }
0x1448   :  { %v2093_v20 = vpop.eup %2092 }
0x1449   :  { %v922_v23 = vadd.f32 1.0, %v2093_v20 }
0x144b   :  { %946 = vperm.xlu1 %2021, %v944_v17   ;;  %2094 = vrcp.f32 %v922_v23 }
0x1458   :  { %v2095_v52 = vpop.eup %2094 }
0x1459   :  { %v926_v29 = vmul.f32 %v2095_v52, %v871_v26 }
0x14b9   :  { %v929_v24 = vpop.permute.xlu1 %928 }
0x14ba   :  { %v931_v25 = vmul.f32 %v2095_v52, %v929_v24 }
0x14bc   :  { %933 = vrot.lane.b32.xlu0 %v931_v25, %s2217_s15 }
0x14c6   :  { %v947_v33 = vpop.permute.xlu1 %946 }
0x14c7   :  { %vm948_vm14 = vcmp.eq.s32.totalorder %v947_v33, 1 }
0x152e   :  { %v934_v30 = vpop.permute.xlu0 %933 }
0x152f   :  { %v936_v31 = vadd.f32 %v934_v30, %v926_v29 }
0x1531   :  { %2096 = vtanh.f32 %v936_v31  ;;  %v950_v53 = vsel %vm948_vm14, %v936_v31, %v871_v26 }
0x153e   :  { %v2097_v21 = vpop.eup %2096 }
0x153f   :  { %939 = vrot.lane.b32.xlu0 %v2097_v21, %s2216_s14 }
0x15b1   :  { %v940_v27 = vpop.permute.xlu0 %939 }
0x15b2   :  { %v942_v34 = vmul.f32 %v2095_v52, %v940_v27 }
0x15b4   :  { %v949_v35 = vsel %vm948_vm14, %v942_v34, %v2518_v54 }
0x15b5   :  { %v951_v36 = vpack.c.bf16 %v949_v35, %v949_v35 }
0x15b7   :  { %953 = vrot.lane.b32.xlu1 %v951_v36, %s2217_s15  ;;  %v284_v36 = vadd.f32 %v2544_v19, %v2347_v28 }
0x1629   :  { %v954_v37 = vpop.permute.xlu1 %953 }
0x162a   :  { %1941 = vmatmul.mubr.msk.bf16.vlgmr.msra.gmra.mxu1 %vm322_vm9, %v954_v37 }
0x162b   :  { %1953 = vmatpush3.bf16.msra.mxu1 %v2296_v9  ;;  %1956 = vmatprep.mubr.msk.bf16.mxu1 %vm2214_vm0, %v2213_v7 }
0x162c   :  { %1954 = vmatprep.subr.bf16.mxu1 %v2213_v7 }
0x162f   :  { %1955 = vmatpush3.bf16.msra.mxu1 %v2305_v11 }
0x1630   :  { %1968 = vmatprep.subr.bf16.mxu1 %v2213_v7 }
0x16ea   :  { %v992_v39 = vpop.f32.mrf.mxu1 }
0x16eb   :  { %v993_v40 = vadd.f32 %v992_v39, %v276_v38 }
0x16ec   :  { %v1942_v41 = vpop.f32.mrf.mxu1 }
0x16ed   :  { %2098 = vtanh.f32 %v993_v40  ;;  %v1753_v45 = vmul.f32 -1.442695, %v993_v40 }
0x16ee   :  { %v995_v42 = vpop.f32.mrf.mxu1 }
0x16ef   :  { %2100 = vpow2.f32 %v1753_v45 }
0x16f0   :  { %v1943_v43 = vpop.f32.mrf.mxu1 }
0x16f1   :  { %v1181_v43 = vsel %vm1180_vm3, 1, %v2212_v2 }
0x16fa   :  { %v2099_v9 = vpop.eup %2098 }
0x16fb   :  { %1007 = vrot.lane.b32.xlu0 %v2099_v9, %s2216_s14 }
0x16fc   :  { %v2101_v46 = vpop.eup %2100 }
0x16fd   :  { %v1001_v47 = vadd.f32 1.0, %v2101_v46 }
0x16ff   :  { %1025 = vperm.xlu0 %2020, %v1023_v44   ;;  %2102 = vrcp.f32 %v1001_v47 }
0x170c   :  { %v2103_v48 = vpop.eup %2102 }
0x170d   :  { %v1005_v54 = vmul.f32 %v2103_v48, %v950_v53 }
0x176d   :  { %v1008_v49 = vpop.permute.xlu0 %1007 }
0x176e   :  { %v1010_v50 = vmul.f32 %v2103_v48, %v1008_v49 }
0x1770   :  { %1012 = vrot.lane.b32.xlu1 %v1010_v50, %s2217_s15 }
0x177a   :  { %v1026_v57 = vpop.permute.xlu0 %1025 }
0x177b   :  { %vm1027_vm15 = vcmp.eq.s32.totalorder %v1026_v57, 1 }
0x17e2   :  { %v1013_v55 = vpop.permute.xlu1 %1012 }
0x17e3   :  { %v1015_v56 = vadd.f32 %v1013_v55, %v1005_v54 }
0x17e5   :  { %2104 = vtanh.f32 %v1015_v56  ;;  %v1029_v52 = vsel %vm1027_vm15, %v1015_v56, %v950_v53 }
0x17f2   :  { %v2105_v51 = vpop.eup %2104 }
0x17f3   :  { %1018 = vrot.lane.b32.xlu1 %v2105_v51, %s2216_s14 }
0x1865   :  { %v1019_v58 = vpop.permute.xlu1 %1018 }
0x1866   :  { %v1021_v59 = vmul.f32 %v2103_v48, %v1019_v58  ;;  %v2642_v58 = vld [vmem:[%s2738_s4] ss:$0 sm:$0xff] }
0x1868   :  { %v1028_v60 = vsel %vm1027_vm15, %v1021_v59, %v949_v35  ;;  %v2618_v35 = vld [vmem:[%s2737_s3] sm:$0xff]   ;;  %v287_v59 = vadd.f32 %v2642_v58, %v2546_v0  ;;  %vm1652_vm15 = vcmask 130048  }
0x1869   :  { %v1030_v61 = vpack.c.bf16 %v1028_v60, %v1028_v60 }
0x186b   :  { %1032 = vrot.lane.b32.xlu0 %v1030_v61, %s2217_s15 }
0x18dd   :  { %v1033_v62 = vpop.permute.xlu0 %1032 }
0x18de   :  { %1949 = vmatmul.mubr.msk.bf16.vlgmr.msra.gmra.mxu0 %vm322_vm9, %v1033_v62 }
0x18df   :  { %1961 = vmatpush3.bf16.msra.mxu0 %v2592_v63  ;;  %1964 = vmatprep.mubr.msk.bf16.mxu0 %vm2214_vm0, %v2213_v7 }
0x18e0   :  { %1962 = vmatprep.subr.bf16.mxu0 %v2213_v7 }
0x18e3   :  { %1963 = vmatpush3.bf16.msra.mxu0 %v2305_v11 }
0x18e4   :  { %1976 = vmatprep.subr.bf16.mxu0 %v2213_v7 }
0x199e   :  { %v1071_v8 = vpop.f32.mrf.mxu0 }
0x199f   :  { %v1072_v10 = vadd.f32 %v1071_v8, %v279_v22 }
0x19a0   :  { %v1950_v12 = vpop.f32.mrf.mxu0 }
0x19a1   :  { %2106 = vtanh.f32 %v1072_v10  ;;  %v1755_v11 = vmul.f32 -1.442695, %v1072_v10  ;;  %v2649_v10 = vld [vmem:[%s2735_s1] sm:$0xff] }
0x19a2   :  { %v1074_v13 = vpop.f32.mrf.mxu0  ;;  %vm1259_vm5 = vcmp.gt.s32.totalorder %v2649_v10, 11  ;;  %vm1338_vm7 = vcmp.gt.s32.totalorder %v2649_v10, 12  ;;  %vm1417_vm10 = vcmp.gt.s32.totalorder %v2649_v10, 13  ;;  %vm1496_vm12 = vcmp.gt.s32.totalorder %v2649_v10, 14 }
0x19a3   :  { %2108 = vpow2.f32 %v1755_v11  ;;  %v1260_v13 = vsel %vm1259_vm5, 1, %v2212_v2  ;;  %vm1575_vm14 = vcmp.gt.s32.totalorder %v2649_v10, 15 }
0x19a4   :  { %v1951_v14 = vpop.f32.mrf.mxu0 }
0x19ae   :  { %v2107_v15 = vpop.eup %2106 }
0x19af   :  { %1086 = vrot.lane.b32.xlu1 %v2107_v15, %s2216_s14 }
0x19b0   :  { %v2109_v17 = vpop.eup %2108 }
0x19b1   :  { %v1080_v18 = vadd.f32 1.0, %v2109_v17 }
0x19b3   :  { %1104 = vperm.xlu1 %2021, %v1102_v16   ;;  %2110 = vrcp.f32 %v1080_v18 }
0x19c0   :  { %v2111_v1 = vpop.eup %2110 }
0x19c1   :  { %v1084_v24 = vmul.f32 %v2111_v1, %v1029_v52 }
0x1a21   :  { %v1087_v20 = vpop.permute.xlu1 %1086 }
0x1a22   :  { %v1089_v23 = vmul.f32 %v2111_v1, %v1087_v20 }
0x1a24   :  { %1091 = vrot.lane.b32.xlu0 %v1089_v23, %s2217_s15 }
0x1a2e   :  { %v1105_v30 = vpop.permute.xlu1 %1104 }
0x1a2f   :  { %vm1106_vm2 = vcmp.eq.s32.totalorder %v1105_v30, 1 }
0x1a96   :  { %v1092_v25 = vpop.permute.xlu0 %1091 }
0x1a97   :  { %v1094_v26 = vadd.f32 %v1092_v25, %v1084_v24 }
0x1a99   :  { %2112 = vtanh.f32 %v1094_v26  ;;  %v1108_v47 = vsel %vm1106_vm2, %v1094_v26, %v1029_v52 }
0x1aa6   :  { %v2113_v29 = vpop.eup %2112 }
0x1aa7   :  { %1097 = vrot.lane.b32.xlu0 %v2113_v29, %s2216_s14 }
0x1b19   :  { %v1098_v31 = vpop.permute.xlu0 %1097 }
0x1b1a   :  { %v1100_v21 = vmul.f32 %v2111_v1, %v1098_v31 }
0x1b1c   :  { %v1107_v33 = vsel %vm1106_vm2, %v1100_v21, %v1028_v60  ;;  %v292_v21 = vadd.f32 %v2642_v58, %v2552_v4 }
0x1b1d   :  { %v1109_v27 = vpack.c.bf16 %v1107_v33, %v1107_v33 }
0x1b1f   :  { %1111 = vrot.lane.b32.xlu1 %v1109_v27, %s2217_s15 }
0x1b91   :  { %v1112_v34 = vpop.permute.xlu1 %1111 }
0x1b92   :  { %1957 = vmatmul.mubr.msk.bf16.vlgmr.msra.gmra.mxu1 %vm322_vm9, %v1112_v34 }
0x1b93   :  { %1969 = vmatpush3.bf16.msra.mxu1 %v2592_v63  ;;  %1972 = vmatprep.mubr.msk.bf16.mxu1 %vm2214_vm0, %v2213_v7 }
0x1b94   :  { %1970 = vmatprep.subr.bf16.mxu1 %v2213_v7 }
0x1b97   :  { %1971 = vmatpush3.bf16.msra.mxu1 %v2618_v35 }
0x1b98   :  { %1984 = vmatprep.subr.bf16.mxu1 %v2213_v7 }
0x1c52   :  { %v1150_v37 = vpop.f32.mrf.mxu1 }
0x1c53   :  { %v1151_v38 = vadd.f32 %v1150_v37, %v284_v36 }
0x1c54   :  { %v1958_v39 = vpop.f32.mrf.mxu1 }
0x1c55   :  { %2114 = vtanh.f32 %v1151_v38  ;;  %v1757_v9 = vmul.f32 -1.442695, %v1151_v38  ;;  %v1339_v39 = vsel %vm1338_vm7, 1, %v2212_v2 }
0x1c56   :  { %v1153_v40 = vpop.f32.mrf.mxu1 }
0x1c57   :  { %2116 = vpow2.f32 %v1757_v9 }
0x1c58   :  { %v1959_v41 = vpop.f32.mrf.mxu1 }
0x1c62   :  { %v2115_v42 = vpop.eup %2114 }
0x1c63   :  { %1165 = vrot.lane.b32.xlu0 %v2115_v42, %s2216_s14 }
0x1c64   :  { %v2117_v44 = vpop.eup %2116 }
0x1c65   :  { %v1159_v45 = vadd.f32 1.0, %v2117_v44 }
0x1c67   :  { %1183 = vperm.xlu0 %2020, %v1181_v43   ;;  %2118 = vrcp.f32 %v1159_v45 }
0x1c74   :  { %v2119_v28 = vpop.eup %2118 }
0x1c75   :  { %v1163_v48 = vmul.f32 %v2119_v28, %v1108_v47 }
0x1cd5   :  { %v1166_v19 = vpop.permute.xlu0 %1165 }
0x1cd6   :  { %v1168_v46 = vmul.f32 %v2119_v28, %v1166_v19 }
0x1cd8   :  { %1170 = vrot.lane.b32.xlu1 %v1168_v46, %s2217_s15 }
0x1ce2   :  { %v1184_v53 = vpop.permute.xlu0 %1183 }
0x1ce3   :  { %vm1185_vm4 = vcmp.eq.s32.totalorder %v1184_v53, 1 }
0x1d4a   :  { %v1171_v32 = vpop.permute.xlu1 %1170 }
0x1d4b   :  { %v1173_v49 = vadd.f32 %v1171_v32, %v1163_v48 }
0x1d4d   :  { %2120 = vtanh.f32 %v1173_v49  ;;  %v1187_v18 = vsel %vm1185_vm4, %v1173_v49, %v1108_v47 }
0x1d5a   :  { %v2121_v50 = vpop.eup %2120 }
0x1d5b   :  { %1176 = vrot.lane.b32.xlu1 %v2121_v50, %s2216_s14 }
0x1dcd   :  { %v1177_v54 = vpop.permute.xlu1 %1176 }
0x1dce   :  { %v1179_v55 = vmul.f32 %v2119_v28, %v1177_v54  ;;  %v295_v54 = vadd.f32 %v2642_v58, %v2556_v6 }
0x1dd0   :  { %v1186_v56 = vsel %vm1185_vm4, %v1179_v55, %v1107_v33 }
0x1dd1   :  { %v1188_v51 = vpack.c.bf16 %v1186_v56, %v1186_v56 }
0x1dd3   :  { %1190 = vrot.lane.b32.xlu0 %v1188_v51, %s2217_s15 }
0x1e45   :  { %v1191_v57 = vpop.permute.xlu0 %1190 }
0x1e46   :  { %1965 = vmatmul.mubr.msk.bf16.vlgmr.msra.gmra.mxu0 %vm322_vm9, %v1191_v57 }
0x1e47   :  { %1977 = vmatpush3.bf16.msra.mxu0 %v2592_v63  ;;  %1980 = vmatprep.mubr.msk.bf16.mxu0 %vm2214_vm0, %v2213_v7 }
0x1e48   :  { %1978 = vmatprep.subr.bf16.mxu0 %v2213_v7 }
0x1e4b   :  { %1979 = vmatpush3.bf16.msra.mxu0 %v2618_v35 }
0x1e4c   :  { %1992 = vmatprep.subr.bf16.mxu0 %v2213_v7 }
0x1f06   :  { %v1229_v60 = vpop.f32.mrf.mxu0 }
0x1f07   :  { %v1230_v61 = vadd.f32 %v1229_v60, %v287_v59 }
0x1f08   :  { %v1966_v62 = vpop.f32.mrf.mxu0 }
0x1f09   :  { %2122 = vtanh.f32 %v1230_v61  ;;  %v1759_v0 = vmul.f32 -1.442695, %v1230_v61 }
0x1f0a   :  { %v1232_v22 = vpop.f32.mrf.mxu0 }
0x1f0b   :  { %2124 = vpow2.f32 %v1759_v0 }
0x1f0c   :  { %v1967_v8 = vpop.f32.mrf.mxu0 }
0x1f16   :  { %v2123_v12 = vpop.eup %2122 }
0x1f17   :  { %1244 = vrot.lane.b32.xlu1 %v2123_v12, %s2216_s14 }
0x1f18   :  { %v2125_v14 = vpop.eup %2124 }
0x1f19   :  { %v1238_v15 = vadd.f32 1.0, %v2125_v14 }
0x1f1b   :  { %1262 = vperm.xlu1 %2021, %v1260_v13   ;;  %2126 = vrcp.f32 %v1238_v15 }
0x1f28   :  { %v2127_v16 = vpop.eup %2126 }
0x1f29   :  { %v1242_v1 = vmul.f32 %v2127_v16, %v1187_v18 }
0x1f89   :  { %v1245_v11 = vpop.permute.xlu1 %1244 }
0x1f8a   :  { %v1247_v17 = vmul.f32 %v2127_v16, %v1245_v11 }
0x1f8c   :  { %1249 = vrot.lane.b32.xlu0 %v1247_v17, %s2217_s15 }
0x1f96   :  { %v1263_v24 = vpop.permute.xlu1 %1262 }
0x1f97   :  { %vm1264_vm6 = vcmp.eq.s32.totalorder %v1263_v24, 1 }
0x1ffe   :  { %v1250_v20 = vpop.permute.xlu0 %1249 }
0x1fff   :  { %v1252_v23 = vadd.f32 %v1250_v20, %v1242_v1 }
0x2001   :  { %2128 = vtanh.f32 %v1252_v23  ;;  %v1266_v44 = vsel %vm1264_vm6, %v1252_v23, %v1187_v18  ;;  %v300_v23 = vadd.f32 %v2642_v58, %v2550_v3 }
0x200e   :  { %v2129_v52 = vpop.eup %2128 }
0x200f   :  { %1255 = vrot.lane.b32.xlu0 %v2129_v52, %s2216_s14 }
0x2081   :  { %v1256_v25 = vpop.permute.xlu0 %1255 }
0x2082   :  { %v1258_v26 = vmul.f32 %v2127_v16, %v1256_v25 }
0x2084   :  { %v1265_v29 = vsel %vm1264_vm6, %v1258_v26, %v1186_v56 }
0x2085   :  { %v1267_v30 = vpack.c.bf16 %v1265_v29, %v1265_v29 }
0x2087   :  { %1269 = vrot.lane.b32.xlu1 %v1267_v30, %s2217_s15 }
0x20f9   :  { %v1270_v31 = vpop.permute.xlu1 %1269 }
0x20fa   :  { %1973 = vmatmul.mubr.msk.bf16.vlgmr.msra.gmra.mxu1 %vm322_vm9, %v1270_v31  ;;  %v1497_v31 = vsel %vm1496_vm12, 1, %v2212_v2 }
0x20fb   :  { %1985 = vmatpush3.bf16.msra.mxu1 %v2592_v63  ;;  %1988 = vmatprep.mubr.msk.bf16.mxu1 %vm2214_vm0, %v2213_v7 }
0x20fc   :  { %1986 = vmatprep.subr.bf16.mxu1 %v2213_v7 }
0x20ff   :  { %1987 = vmatpush3.bf16.msra.mxu1 %v2618_v35 }
0x2100   :  { %2000 = vmatprep.subr.bf16.mxu1 %v2213_v7 }
0x21ba   :  { %v1308_v33 = vpop.f32.mrf.mxu1 }
0x21bb   :  { %v1309_v27 = vadd.f32 %v1308_v33, %v292_v21 }
0x21bc   :  { %v1974_v34 = vpop.f32.mrf.mxu1 }
0x21bd   :  { %2130 = vtanh.f32 %v1309_v27  ;;  %v1761_v40 = vmul.f32 -1.442695, %v1309_v27 }
0x21be   :  { %v1311_v36 = vpop.f32.mrf.mxu1 }
0x21bf   :  { %2132 = vpow2.f32 %v1761_v40 }
0x21c0   :  { %v1975_v37 = vpop.f32.mrf.mxu1 }
0x21ca   :  { %v2131_v38 = vpop.eup %2130 }
0x21cb   :  { %1323 = vrot.lane.b32.xlu0 %v2131_v38, %s2216_s14 }
0x21cc   :  { %v2133_v41 = vpop.eup %2132 }
0x21cd   :  { %v1317_v42 = vadd.f32 1.0, %v2133_v41 }
0x21cf   :  { %1341 = vperm.xlu0 %2020, %v1339_v39   ;;  %2134 = vrcp.f32 %v1317_v42 }
0x21dc   :  { %v2135_v4 = vpop.eup %2134 }
0x21dd   :  { %v1321_v45 = vmul.f32 %v2135_v4, %v1266_v44 }
0x223d   :  { %v1324_v43 = vpop.permute.xlu0 %1323 }
0x223e   :  { %v1326_v9 = vmul.f32 %v2135_v4, %v1324_v43 }
0x2240   :  { %1328 = vrot.lane.b32.xlu1 %v1326_v9, %s2217_s15 }
0x224a   :  { %v1342_v47 = vpop.permute.xlu0 %1341 }
0x224b   :  { %vm1343_vm8 = vcmp.eq.s32.totalorder %v1342_v47, 1 }
0x22b2   :  { %v1329_v28 = vpop.permute.xlu1 %1328 }
0x22b3   :  { %v1331_v19 = vadd.f32 %v1329_v28, %v1321_v45  ;;  %v303_v28 = vadd.f32 %v2642_v58, %v2554_v5 }
0x22b5   :  { %2136 = vtanh.f32 %v1331_v19  ;;  %v1345_v12 = vsel %vm1343_vm8, %v1331_v19, %v1266_v44 }
0x22c2   :  { %v2137_v46 = vpop.eup %2136 }
0x22c3   :  { %1334 = vrot.lane.b32.xlu1 %v2137_v46, %s2216_s14 }
0x2335   :  { %v1335_v48 = vpop.permute.xlu1 %1334 }
0x2336   :  { %v1337_v32 = vmul.f32 %v2135_v4, %v1335_v48 }
0x2338   :  { %v1344_v49 = vsel %vm1343_vm8, %v1337_v32, %v1265_v29 }
0x2339   :  { %v1346_v50 = vpack.c.bf16 %v1344_v49, %v1344_v49 }
0x233b   :  { %1348 = vrot.lane.b32.xlu0 %v1346_v50, %s2217_s15  ;;  %v1576_v50 = vsel %vm1575_vm14, 1, %v2212_v2 }
0x23ad   :  { %v1349_v53 = vpop.permute.xlu0 %1348 }
0x23ae   :  { %1981 = vmatmul.mubr.msk.bf16.vlgmr.msra.gmra.mxu0 %vm322_vm9, %v1349_v53 }
0x23af   :  { %1993 = vmatpush3.bf16.msra.mxu0 %v2592_v63  ;;  %1996 = vmatprep.mubr.msk.bf16.mxu0 %vm2214_vm0, %v2213_v7  ;;  %v1418_v63 = vsel %vm1417_vm10, 1, %v2212_v2  ;;  %v2032_v2 = vld [vmem:[%s2739_s5 + $0x8] sm:$0xff]  }
0x23b0   :  { %1994 = vmatprep.subr.bf16.mxu0 %v2213_v7 }
0x23b3   :  { %1995 = vmatpush3.bf16.msra.mxu0 %v2618_v35 }
0x246e   :  { %v1387_v55 = vpop.f32.mrf.mxu0 }
0x246f   :  { %v1388_v56 = vadd.f32 %v1387_v55, %v295_v54 }
0x2470   :  { %v1982_v51 = vpop.f32.mrf.mxu0 }
0x2471   :  { %2138 = vtanh.f32 %v1388_v56  ;;  %v1763_v61 = vmul.f32 -1.442695, %v1388_v56 }
0x2472   :  { %v1390_v57 = vpop.f32.mrf.mxu0 }
0x2473   :  { %2140 = vpow2.f32 %v1763_v61 }
0x2474   :  { %v1983_v59 = vpop.f32.mrf.mxu0 }
0x247e   :  { %v2139_v60 = vpop.eup %2138 }
0x247f   :  { %1402 = vrot.lane.b32.xlu1 %v2139_v60, %s2216_s14  ;;  %v2033_v60 = vld [vmem:[%s2739_s5] sm:$0xff]   ;;  %s2218_s5 = smov 16  }
0x2480   :  { %v2141_v35 = vpop.eup %2140 }
0x2481   :  { %v1396_v62 = vadd.f32 1.0, %v2141_v35 }
0x2483   :  { %1420 = vperm.xlu1 %2021, %v1418_v63   ;;  %2142 = vrcp.f32 %v1396_v62 }
0x2490   :  { %v2143_v6 = vpop.eup %2142 }
0x2491   :  { %v1400_v13 = vmul.f32 %v2143_v6, %v1345_v12 }
0x24f1   :  { %v1403_v22 = vpop.permute.xlu1 %1402 }
0x24f2   :  { %v1405_v8 = vmul.f32 %v2143_v6, %v1403_v22 }
0x24f4   :  { %1407 = vrot.lane.b32.xlu0 %v1405_v8, %s2217_s15 }
0x24fe   :  { %v1421_v16 = vpop.permute.xlu1 %1420 }
0x24ff   :  { %vm1422_vm11 = vcmp.eq.s32.totalorder %v1421_v16, 1 }
0x2566   :  { %v1408_v0 = vpop.permute.xlu0 %1407 }
0x2567   :  { %v1410_v14 = vadd.f32 %v1408_v0, %v1400_v13 }
0x2569   :  { %2144 = vtanh.f32 %v1410_v14  ;;  %v1424_v37 = vsel %vm1422_vm11, %v1410_v14, %v1345_v12  ;;  %v1768_v12 = vld [vmem:[%s2740_s6] ss:$0 sm:$0xff]  ;;  %s2220_s6 = smov [#allocation2]  }
0x2576   :  { %v2145_v15 = vpop.eup %2144 }
0x2577   :  { %1413 = vrot.lane.b32.xlu0 %v2145_v15, %s2216_s14 }
0x25e9   :  { %v1414_v11 = vpop.permute.xlu0 %1413 }
0x25ea   :  { %v1416_v17 = vmul.f32 %v2143_v6, %v1414_v11 }
0x25ec   :  { %v1423_v18 = vsel %vm1422_vm11, %v1416_v17, %v1344_v49 }
0x25ed   :  { %v1425_v1 = vpack.c.bf16 %v1423_v18, %v1423_v18 }
0x25ef   :  { %1427 = vrot.lane.b32.xlu1 %v1425_v1, %s2217_s15 }
0x2661   :  { %v1428_v20 = vpop.permute.xlu1 %1427 }
0x2662   :  { %1989 = vmatmul.mubr.msk.bf16.vlgmr.msra.gmra.mxu1 %vm322_vm9, %v1428_v20 }
0x2663   :  { %2004 = vmatprep.mubr.msk.bf16.mxu1 %vm2214_vm0, %v2213_v7  ;;  %2001 = vmatpush3.bf16.msra.mxu1 %v2032_v2 }
0x2664   :  { %2002 = vmatprep.subr.bf16.mxu1 %v2213_v7 }
0x2667   :  { %2003 = vmatpush3.bf16.msra.mxu1 %v2033_v60 }
0x2722   :  { %v1466_v52 = vpop.f32.mrf.mxu1 }
0x2723   :  { %v1467_v24 = vadd.f32 %v1466_v52, %v300_v23 }
0x2724   :  { %v1990_v25 = vpop.f32.mrf.mxu1 }
0x2725   :  { %2146 = vtanh.f32 %v1467_v24  ;;  %v1765_v21 = vmul.f32 -1.442695, %v1467_v24 }
0x2726   :  { %v1469_v26 = vpop.f32.mrf.mxu1 }
0x2727   :  { %2148 = vpow2.f32 %v1765_v21 }
0x2728   :  { %v1991_v29 = vpop.f32.mrf.mxu1 }
0x2732   :  { %v2147_v30 = vpop.eup %2146 }
0x2733   :  { %1481 = vrot.lane.b32.xlu0 %v2147_v30, %s2216_s14 }
0x2734   :  { %v2149_v33 = vpop.eup %2148 }
0x2735   :  { %v1475_v27 = vadd.f32 1.0, %v2149_v33 }
0x2737   :  { %1499 = vperm.xlu0 %2020, %v1497_v31   ;;  %2150 = vrcp.f32 %v1475_v27 }
0x2744   :  { %v2151_v3 = vpop.eup %2150 }
0x2745   :  { %v1479_v38 = vmul.f32 %v2151_v3, %v1424_v37 }
0x27a5   :  { %v1482_v34 = vpop.permute.xlu0 %1481 }
0x27a6   :  { %v1484_v36 = vmul.f32 %v2151_v3, %v1482_v34 }
0x27a8   :  { %1486 = vrot.lane.b32.xlu1 %v1484_v36, %s2217_s15 }
0x27b2   :  { %v1500_v42 = vpop.permute.xlu0 %1499 }
0x27b3   :  { %vm1501_vm0 = vcmp.eq.s32.totalorder %v1500_v42, 1 }
0x281a   :  { %v1487_v39 = vpop.permute.xlu1 %1486 }
0x281b   :  { %v1489_v40 = vadd.f32 %v1487_v39, %v1479_v38 }
0x281d   :  { %2152 = vtanh.f32 %v1489_v40  ;;  %v1503_v51 = vsel %vm1501_vm0, %v1489_v40, %v1424_v37 }
0x282a   :  { %v2153_v41 = vpop.eup %2152 }
0x282b   :  { %1492 = vrot.lane.b32.xlu1 %v2153_v41, %s2216_s14 }
0x289d   :  { %v1493_v4 = vpop.permute.xlu1 %1492 }
0x289e   :  { %v1495_v43 = vmul.f32 %v2151_v3, %v1493_v4 }
0x28a0   :  { %v1502_v9 = vsel %vm1501_vm0, %v1495_v43, %v1423_v18 }
0x28a1   :  { %v1504_v44 = vpack.c.bf16 %v1502_v9, %v1502_v9 }
0x28a3   :  { %1506 = vrot.lane.b32.xlu0 %v1504_v44, %s2217_s15 }
0x2915   :  { %v1507_v45 = vpop.permute.xlu0 %1506 }
0x2916   :  { %1997 = vmatmul.mubr.msk.bf16.vlgmr.msra.gmra.mxu0 %vm322_vm9, %v1507_v45 }
0x29d6   :  { %v1545_v19 = vpop.f32.mrf.mxu0 }
0x29d7   :  { %v1546_v46 = vadd.f32 %v1545_v19, %v303_v28 }
0x29d8   :  { %v1998_v47 = vpop.f32.mrf.mxu0 }
0x29d9   :  { %2154 = vtanh.f32 %v1546_v46  ;;  %v1767_v53 = vmul.f32 -1.442695, %v1546_v46 }
0x29da   :  { %v1548_v48 = vpop.f32.mrf.mxu0 }
0x29db   :  { %2156 = vpow2.f32 %v1767_v53 }
0x29dc   :  { %v1999_v32 = vpop.f32.mrf.mxu0 }
0x29e6   :  { %v2155_v49 = vpop.eup %2154 }
0x29e7   :  { %1560 = vrot.lane.b32.xlu1 %v2155_v49, %s2216_s14 }
0x29e8   :  { %v2157_v54 = vpop.eup %2156 }
0x29e9   :  { %v1554_v55 = vadd.f32 1.0, %v2157_v54 }
0x29eb   :  { %1578 = vperm.xlu1 %2021, %v1576_v50   ;;  %2158 = vrcp.f32 %v1554_v55 }
0x29f8   :  { %v2159_v5 = vpop.eup %2158 }
0x29f9   :  { %v1558_v57 = vmul.f32 %v2159_v5, %v1503_v51 }
0x2a59   :  { %v1561_v58 = vpop.permute.xlu1 %1560 }
0x2a5a   :  { %v1563_v56 = vmul.f32 %v2159_v5, %v1561_v58 }
0x2a5c   :  { %1565 = vrot.lane.b32.xlu0 %v1563_v56, %s2217_s15 }
0x2a66   :  { %v1579_v61 = vpop.permute.xlu1 %1578 }
0x2a67   :  { %vm1580_vm13 = vcmp.eq.s32.totalorder %v1579_v61, 1 }
0x2ace   :  { %v1566_v10 = vpop.permute.xlu0 %1565 }
0x2acf   :  { %v1568_v59 = vadd.f32 %v1566_v10, %v1558_v57 }
0x2ad1   :  { %2160 = vtanh.f32 %v1568_v59 }
0x2ade   :  { %v2161_v63 = vpop.eup %2160 }
0x2adf   :  { %1571 = vrot.lane.b32.xlu0 %v2161_v63, %s2216_s14  ;;  %s2219_s14 = smov 112  }
0x2b51   :  { %v1572_v35 = vpop.permute.xlu0 %1571 }
0x2b52   :  { %v1574_v62 = vmul.f32 %v2159_v5, %v1572_v35 }
0x2b54   :  { %v1581_v6 = vsel %vm1580_vm13, %v1574_v62, %v1502_v9 }
0x2b55   :  { %v1582_v22 = vpack.c.bf16 %v1581_v6, %v1581_v6 }
0x2b57   :  { %1595 = vrot.lane.b32.xlu1 %v1582_v22, %s2217_s15  ;;  %s1688_s15 = sshll.u32 %s2220_s6, 4  ;;  %s1689_s15 = int_to_ptr.vmem [resolvable:$true] %s1688_s15 }
0x2b58   :  { %s2168_s29 = scalar_lea.vmem %s1689_s15, 128  ;;  %p2173_p1 = scmp.lt.s32.totalorder %s1689_s15, %s1689_s15 }
0x2b59   :  { %p2169_p0 = scmp.ne.s32.totalorder %s1689_s15, %s2168_s29  ;;  %p2174_p2 = scmp.lt.s32.totalorder %s2168_s29, %s2168_s29 }
0x2b5b   :  { %p2175_p3 = por %p2174_p2, %p2173_p1 }
0x2b5d   :  { %p2176_p4 = pnand %p2175_p3, %p2169_p0 }
0x2bc9   :  { %v1596_v8 = vpop.permute.xlu1 %1595 }
0x2bca   :  { %2005 = vmatmul.mubr.msk.bf16.vlgmr.msra.gmra.mxu1 %vm322_vm9, %v1596_v8 }
0x2c8a   :  { %v1646_v7 = vpop.f32.mrf.mxu1 }
0x2c8b   :  { %v1647_v13 = vadd.f32 %v1768_v12, %v1646_v7 }
0x2c8c   :  { %v2006_v0 = vpop.f32.mrf.mxu1 }
0x2c8d   :  { %v1658_v14 = vmul.f32 %v1647_v13, %v1647_v13  ;;  %1653 = vst.msk [vmem:[#allocation2] sm:$0xff] %vm1652_vm15, %v1647_v13  ;;  %v1654_v11 = vmul.f32 1.442695, %v1647_v13 }
0x2c8e   :  { %v1649_v15 = vpop.f32.mrf.mxu1 }
0x2c8f   :  { %1660 = vrot.lane.b32.xlu0 %v1658_v14, %s2218_s5  ;;  %2162 = vpow2.f32 %v1654_v11 }
0x2c90   :  { %v2007_v16 = vpop.f32.mrf.mxu1 }
0x2c9c   :  { %v2163_v17 = vpop.eup %2162 }
0x2c9d   :  { %v1656_v18 = vsub.f32 %v2163_v17, %v1647_v13 }
0x2c9f   :  { %v1772_v1 = vadd.f32 -1.0, %v1656_v18 }
0x2d01   :  { %v1661_v20 = vpop.permute.xlu0 %1660 }
0x2d02   :  { %v1663_v23 = vadd.f32 %v1772_v1, %v1661_v20 }
0x2d04   :  { %1665 = vrot.lane.b32.xlu1 %v1663_v23, %s2219_s14 }
0x2d76   :  { %v1666_v52 = vpop.permute.xlu1 %1665 }
0x2d77   :  { %v1668_v24 = vsel %vm1652_vm15, %v1666_v52, 0.0 }
0x2d78   :  { %1669 = vadd.xlane.f32.xlu0 %v1668_v24 }
0x2d79   :  { %2179 = shalt.err (!%p2176_p4)
}
0x2d7a   :  { %1691 = dma.vmem_to_hbm [thread:$0]  %s1689_s15, 128, %s2741_s7, [#allocation3]   ;;  %vm1680_vm9 = vcmask 0  }
0x2d7b   :  { %s2221_s10 = smov [#allocation4]  }
0x2d7c   :  { %s1698_s2 = sshll.u32 %s2221_s10, 4  ;;  %s1699_s2 = int_to_ptr.vmem [resolvable:$true] %s1698_s2 }
0x2d7d   :  { %s2188_s12 = scalar_lea.vmem %s1699_s2, 16  ;;  %s2192_s13 = scalar_lea.vmem %s1699_s2, 32 }
0x2d7e   :  { %p2189_p5 = scmp.ne.s32.totalorder %s1699_s2, %s2188_s12  ;;  %p2193_p6 = scmp.lt.s32.totalorder %s1699_s2, %s1699_s2 }
0x2d7f   :  { %p2194_p7 = scmp.lt.s32.totalorder %s2192_s13, %s2188_s12 }
0x2d81   :  { %p2195_p8 = por %p2194_p7, %p2193_p6 }
0x2d83   :  { %p2196_p9 = pnand %p2195_p8, %p2189_p5 }
0x2e01   :  { %v1670_v25 = vpop.xlane.xlu0 %1669 }
0x2e02   :  { %v1671_v26 = vrot.slane %v1670_v25, 4 }
0x2e04   :  { %v1672_v29 = vadd.f32 %v1671_v26, %v1670_v25 }
0x2e06   :  { %v1673_v30 = vrot.slane %v1672_v29, 2 }
0x2e08   :  { %v1674_v31 = vadd.f32 %v1673_v30, %v1672_v29 }
0x2e0a   :  { %v1675_v21 = vrot.slane %v1674_v31, 1 }
0x2e0c   :  { %v1676_v33 = vadd.f32 %v1675_v21, %v1674_v31 }
0x2e0e   :  { %2008 = vpush %v1676_v33 }
0x2e3f   :  { %s2009_s11 = spop %2008 }
0x2e40   :  { %v1678_v27 = vstv %s2009_s11 }
0x2e41   :  { %v1679_v3 = vmul.f32 0.5, %v1678_v27 }
0x2e43   :  { %1681 = vst.msk [vmem:[#allocation4] sm:$0x1] %vm1680_vm9, %v1679_v3 }
0x2e44   :  { %2199 = shalt.err (!%p2196_p9)
}
0x2e45   :  { %1701 = dma.vmem_to_hbm [thread:$0]  %s1699_s2, 16, %s2742_s8, [#allocation5]  }
0x2e46   :  { %2208 = dma.done.wait [#allocation3], 128  }
0x2e47   :  { %2209 = vsyncadd [#allocation3], 4294967168 }
0x2e48   :  { %2210 = dma.done.wait [#allocation5], 16  }
0x2e49   :  { %2211 = vsyncadd [#allocation5], 4294967280 }
0x2e4a   :  { %1708 = vsyncpa [#allocation3], 1 }
0x2e4b   :  { %1709 = vsyncpa [#allocation5], 1 }

</bundles_post_ra>
